<compile_context>
chip_gen: v7x
topology: tpu7x:2x2x1
jax: 0.10.0
libtpu: 0.0.40
codegen_flags: <defaults>
</compile_context>

<pallas_src>
import jax
import jax.numpy as jnp
from jax import lax
from jax.experimental import pallas as pl
from jax.experimental.pallas import tpu as pltpu


# ----------------------------------------------------------------------------
# Fused forward kernel (built per static shape configuration).
# ----------------------------------------------------------------------------
def _make_kernel(B, T, D, H, n_fc):
    H2, H4, H6, H8 = 2 * H, 4 * H, 6 * H, 8 * H

    def kernel(*refs):
        x_ref, wih_ref, wbig_ref, bfg_ref = refs[:4]
        fc_refs = [(refs[4 + 2 * i], refs[5 + 2 * i]) for i in range(n_fc)]
        out_ref = refs[4 + 2 * n_fc]

        x = x_ref[...]                                  # (T*B, D) f32, t-major rows
        wih = wih_ref[...].astype(jnp.float32)          # (D, 8H)   bf16 -> f32 once
        wbig = wbig_ref[...].astype(jnp.float32)        # (2H, 8H)  bf16 -> f32 once
        bfg = bfg_ref[...]                              # (1, 8H)   f32

        # Layer-0 input projection for ALL timesteps, hoisted off the recurrence.
        # Rows are (t, b) ordered, so per-step slices below are contiguous sublanes.
        pre = jnp.dot(x, wih, preferred_element_type=jnp.float32) + bfg   # (T*B, 8H)

        def fused_step(hc, cc, addend):
            # One dot covers: layer-0 recurrence, layer-1 input projection and
            # layer-1 recurrence (block upper-triangular W_big).
            gst = jnp.dot(hc, wbig, preferred_element_type=jnp.float32)   # (B, 8H)
            s = jax.nn.sigmoid(gst + addend)      # single EUP pass over all 8 gates
            i = s[:, 0:H2]                        # [i0 | i1]
            f = s[:, H2:H4]                       # [f0 | f1]
            g = 2.0 * s[:, H4:H6] - 1.0           # tanh(x) = 2*sigmoid(2x) - 1
            o = s[:, H6:H8]                       # [o0 | o1]
            cc = f * cc + i * g
            hc = o * jnp.tanh(cc)                 # single tanh pass over both layers
            return hc, cc

        zeros = jnp.zeros((B, H2), jnp.float32)
        keep_l0 = lax.broadcasted_iota(jnp.int32, (B, H2), 1) < H

        # wavefront step 0: only layer 0 is real; reset layer-1 half to its t=-1
        # state (zeros) so the next step sees h1_{-1} = c1_{-1} = 0.
        hc, cc = fused_step(zeros, zeros, pre[0:B, :])
        hc = jnp.where(keep_l0, hc, 0.0)
        cc = jnp.where(keep_l0, cc, 0.0)

        # wavefront steps 1..T-1: layer-0 step w and layer-1 step w-1, fused.
        for w in range(1, T):
            hc, cc = fused_step(hc, cc, pre[w * B:(w + 1) * B, :])

        # wavefront step T: only layer 1 (its last timestep); layer-0 half discarded.
        hc, _ = fused_step(hc, cc, bfg)
        z = hc[:, H:H2]                           # == out[:, -1] of the top layer

        # ---- fused MLP head (widths zero-padded to 128-lane multiples) ----
        for i, (w_ref, b_ref) in enumerate(fc_refs):
            z = jnp.dot(z, w_ref[...].astype(jnp.float32),
                        preferred_element_type=jnp.float32) + b_ref[...]
            if i < n_fc - 1:
                z = jnp.maximum(z, 0.0)
        out_ref[...] = z.astype(out_ref.dtype)

    return kernel


def zloc_forward(x_btd, wih0_fg, w_big, bfg, fc_params):
    """Full fused forward: (B, T, D) -> (B, 1) in a single pallas_call."""
    B, T, D = x_btd.shape
    H = w_big.shape[0] // 2
    n_fc = len(fc_params)

    # (B,T,D) -> (T*B,D): t-major rows so in-kernel per-timestep slices are
    # contiguous sublane windows (trivial XLA op, outside the latency-bound kernel).
    x_flat = jnp.transpose(x_btd, (1, 0, 2)).reshape(T * B, D).astype(jnp.float32)

    flat = [x_flat, wih0_fg, w_big, bfg]
    for w, b in fc_params:
        flat += [w, b]

    vmem = pl.BlockSpec(memory_space=pltpu.MemorySpace.VMEM)
    return pl.pallas_call(
        _make_kernel(B, T, D, H, n_fc),
        out_shape=jax.ShapeDtypeStruct((B, 1), jnp.float32),
        in_specs=[vmem] * len(flat),
        out_specs=vmem,
    )(*flat)


# ----------------------------------------------------------------------------
# Pure-JAX reference (lax.scan, unfolded / unpadded params) for validation.
# ----------------------------------------------------------------------------
def _lstm_layer_ref(x_tbd, wih_t, whh_t, b):
    T, B, _ = x_tbd.shape
    H = whh_t.shape[0]

    def step(carry, x_t):
        h, c = carry
        gates = x_t @ wih_t + h @ whh_t + b
        i_g = jax.nn.sigmoid(gates[:, 0 * H:1 * H])
        f_g = jax.nn.sigmoid(gates[:, 1 * H:2 * H])
        g_g = jnp.tanh(gates[:, 2 * H:3 * H])
        o_g = jax.nn.sigmoid(gates[:, 3 * H:4 * H])
        c = f_g * c + i_g * g_g
        h = o_g * jnp.tanh(c)
        return (h, c), h

    init = (jnp.zeros((B, H), jnp.float32), jnp.zeros((B, H), jnp.float32))
    _, outs = lax.scan(step, init, x_tbd)
    return outs


def zloc_forward_ref(x_btd, lstm_params, fc_params):
    h = jnp.transpose(x_btd, (1, 0, 2))
    for wih_t, whh_t, b in lstm_params:
        h = _lstm_layer_ref(h, wih_t, whh_t, b)
    z = h[-1]
    for idx, (w_t, b) in enumerate(fc_params):
        z = z @ w_t + b
        if idx < len(fc_params) - 1:
            z = jnp.maximum(z, 0.0)
    return z


# ----------------------------------------------------------------------------
# Parameter init (PyTorch-style uniform bounds) + kernel-side preparation.
# ----------------------------------------------------------------------------
def init_params(key, input_dim, hidden_dim, layer_dim):
    lstm_params = []
    k = hidden_dim ** -0.5
    d_in = input_dim
    for _ in range(layer_dim):
        key, k1, k2, k3, k4 = jax.random.split(key, 5)
        wih = jax.random.uniform(k1, (4 * hidden_dim, d_in), jnp.float32, -k, k)
        whh = jax.random.uniform(k2, (4 * hidden_dim, hidden_dim), jnp.float32, -k, k)
        bih = jax.random.uniform(k3, (4 * hidden_dim,), jnp.float32, -k, k)
        bhh = jax.random.uniform(k4, (4 * hidden_dim,), jnp.float32, -k, k)
        lstm_params.append((wih.T, whh.T, (bih + bhh)[None, :]))
        d_in = hidden_dim

    layersize = [306, 154, 76]
    fc_params = []
    n_in = hidden_dim
    for n_out in layersize + [1]:
        key, k1, k2 = jax.random.split(key, 3)
        bound = n_in ** -0.5
        w = jax.random.uniform(k1, (n_out, n_in), jnp.float32, -bound, bound)
        b = jax.random.uniform(k2, (n_out,), jnp.float32, -bound, bound)
        fc_params.append((w.T, b[None, :]))
        n_in = n_out
    return lstm_params, fc_params


def round_weights_bf16(lstm_params, fc_params):
    """Round weight matrices to bf16 (and back to f32) once.

    Both the kernel params and the f32 reference are built from these rounded
    values, so the correctness check stays tight while the stored weights (and
    their exposed HBM->VMEM DMA) are bf16."""
    rb = lambda w: w.astype(jnp.bfloat16).astype(jnp.float32)
    lstm_r = [(rb(wih), rb(whh), b) for wih, whh, b in lstm_params]
    fc_r = [(rb(w), b) for w, b in fc_params]
    return lstm_r, fc_r


def prep_kernel_params(lstm_params, fc_params, lane=128):
    """Build fused / folded / padded bf16 kernel weights (semantics preserved)."""
    assert len(lstm_params) == 2, "fused wavefront kernel is specialized to 2 layers"
    (wih0, whh0, b0), (wih1, whh1, b1) = lstm_params
    H = whh0.shape[0]
    D = wih0.shape[0]

    def fold_g2(a):  # fold the x2 of tanh(x)=2*sigmoid(2x)-1 into the g-gate columns
        return a.at[:, 2 * H:3 * H].multiply(2.0)

    def fg(l0, l1):  # interleave gate groups per type: [i0 i1 f0 f1 g0 g1 o0 o1]
        return jnp.concatenate(
            [blk for g in range(4)
             for blk in (l0[:, g * H:(g + 1) * H], l1[:, g * H:(g + 1) * H])],
            axis=1)

    wih0, whh0, b0 = fold_g2(wih0), fold_g2(whh0), fold_g2(b0)
    wih1, whh1, b1 = fold_g2(wih1), fold_g2(whh1), fold_g2(b1)

    z_d = jnp.zeros((D, 4 * H), jnp.float32)
    z_h = jnp.zeros((H, 4 * H), jnp.float32)

    wih0_fg = fg(wih0, z_d).astype(jnp.bfloat16)                  # (D, 8H)
    bfg = fg(b0, b1)                                              # (1, 8H) f32
    # Block upper-triangular fused recurrent weight: [[Whh0, Wih1], [0, Whh1]]
    w_big = jnp.concatenate([fg(whh0, wih1), fg(z_h, whh1)],
                            axis=0).astype(jnp.bfloat16)          # (2H, 8H)

    # Zero-pad FC hidden widths to 128-lane multiples; final output stays width 1.
    fc = []
    extra_in = 0
    n = len(fc_params)
    for idx, (w, b) in enumerate(fc_params):
        w = jnp.pad(w, ((0, extra_in), (0, 0)))
        extra_out = 0 if idx == n - 1 else (-w.shape[1]) % lane
        w = jnp.pad(w, ((0, 0), (0, extra_out)))
        b = jnp.pad(b, ((0, 0), (0, extra_out)))
        fc.append((w.astype(jnp.bfloat16), b))
        extra_in = extra_out
    return wih0_fg, w_big, bfg, fc


if __name__ == "__main__":
    # Shapes consistent with the module's forward:
    # x: (batch=2, seq=8, input_dim=4); hidden_dim=32, layer_dim=2.
    B, T, INPUT_DIM, HIDDEN_DIM, LAYER_DIM = 2, 8, 4, 32, 2

    x = jax.random.normal(jax.random.PRNGKey(0), (B, T, INPUT_DIM), jnp.float32)
    lstm_raw, fc_raw = init_params(
        jax.random.PRNGKey(42), INPUT_DIM, HIDDEN_DIM, LAYER_DIM)

    # bf16 weight storage (review item): round once, build both kernel and ref
    # params from the same rounded values so the check below stays tight.
    lstm_r, fc_r = round_weights_bf16(lstm_raw, fc_raw)
    kparams = prep_kernel_params(lstm_r, fc_r)

    fwd = jax.jit(lambda xx: zloc_forward(xx, *kparams))
    out = fwd(x)
    jax.block_until_ready(out)

    ref = zloc_forward_ref(x, lstm_r, fc_r)
    jax.block_until_ready(ref)

    assert out.shape == (B, 1), out.shape
    assert jnp.allclose(out, ref, rtol=2e-3, atol=2e-3), (out, ref)
    print("KERNEL_OK")
</pallas_src>

<mosaic_0001>
module attributes {stable_mosaic.version = 11 : i64} {
  func.func @kernel(%arg0: memref<16x4xf32, #tpu.memory_space<vmem>>, %arg1: memref<4x256xbf16, #tpu.memory_space<vmem>>, %arg2: memref<64x256xbf16, #tpu.memory_space<vmem>>, %arg3: memref<1x256xf32, #tpu.memory_space<vmem>>, %arg4: memref<32x384xbf16, #tpu.memory_space<vmem>>, %arg5: memref<1x384xf32, #tpu.memory_space<vmem>>, %arg6: memref<384x256xbf16, #tpu.memory_space<vmem>>, %arg7: memref<1x256xf32, #tpu.memory_space<vmem>>, %arg8: memref<256x128xbf16, #tpu.memory_space<vmem>>, %arg9: memref<1x128xf32, #tpu.memory_space<vmem>>, %arg10: memref<128x1xbf16, #tpu.memory_space<vmem>>, %arg11: memref<1x1xf32, #tpu.memory_space<vmem>>, %arg12: memref<2x1xf32, #tpu.memory_space<vmem>>) attributes {dimension_semantics = [], scalar_prefetch = 0 : i64, scratch_operands = 0 : i64, tpu.core_type = #tpu.core_type<tc>} {
    %c0 = arith.constant 0 : index
    %c0_0 = arith.constant 0 : index
    %0 = vector.load %arg0[%c0, %c0_0] : memref<16x4xf32, #tpu.memory_space<vmem>>, vector<16x4xf32>
    %c0_1 = arith.constant 0 : index
    %c0_2 = arith.constant 0 : index
    %1 = vector.load %arg1[%c0_1, %c0_2] : memref<4x256xbf16, #tpu.memory_space<vmem>>, vector<4x256xbf16>
    %2 = arith.extf %1 : vector<4x256xbf16> to vector<4x256xf32>
    %c0_3 = arith.constant 0 : index
    %c0_4 = arith.constant 0 : index
    %3 = vector.load %arg2[%c0_3, %c0_4] : memref<64x256xbf16, #tpu.memory_space<vmem>>, vector<64x256xbf16>
    %4 = arith.extf %3 : vector<64x256xbf16> to vector<64x256xf32>
    %c0_5 = arith.constant 0 : index
    %c0_6 = arith.constant 0 : index
    %5 = vector.load %arg3[%c0_5, %c0_6] : memref<1x256xf32, #tpu.memory_space<vmem>>, vector<1x256xf32>
    %cst = arith.constant dense<0.000000e+00> : vector<16x256xf32>
    %6 = tpu.matmul %0, %2, %cst {dimension_numbers = #tpu.dot_dimension_numbers<[1], [0], [0], [1], [0, 0, 1, 1], [], []>} : vector<16x4xf32>, vector<4x256xf32>, vector<16x256xf32> -> vector<16x256xf32>
    %7 = vector.broadcast %5 : vector<1x256xf32> to vector<16x256xf32>
    %8 = arith.addf %6, %7 : vector<16x256xf32>
    %cst_7 = arith.constant 0.000000e+00 : f32
    %9 = vector.broadcast %cst_7 : f32 to vector<2x64xf32>
    %10 = tpu.iota {dimensions = array<i32: 1>} : vector<2x64xi32>
    %c32_i32 = arith.constant 32 : i32
    %11 = vector.broadcast %c32_i32 : i32 to vector<2x64xi32>
    %12 = arith.cmpi slt, %10, %11 : vector<2x64xi32>
    %13 = vector.extract_strided_slice %8 {offsets = [0, 0], sizes = [2, 256], strides = [1, 1]} : vector<16x256xf32> to vector<2x256xf32>
    %cst_8 = arith.constant dense<0.000000e+00> : vector<2x256xf32>
    %14 = tpu.matmul %9, %4, %cst_8 {dimension_numbers = #tpu.dot_dimension_numbers<[1], [0], [0], [1], [0, 0, 1, 1], [], []>} : vector<2x64xf32>, vector<64x256xf32>, vector<2x256xf32> -> vector<2x256xf32>
    %15 = arith.addf %14, %13 : vector<2x256xf32>
    %16 = arith.negf %15 : vector<2x256xf32>
    %17 = math.exp %16 : vector<2x256xf32>
    %cst_9 = arith.constant 1.000000e+00 : f32
    %18 = vector.broadcast %cst_9 : f32 to vector<2x256xf32>
    %19 = arith.addf %18, %17 : vector<2x256xf32>
    %20 = arith.divf %18, %19 : vector<2x256xf32>
    %21 = vector.extract_strided_slice %20 {offsets = [0, 0], sizes = [2, 64], strides = [1, 1]} : vector<2x256xf32> to vector<2x64xf32>
    %22 = vector.extract_strided_slice %20 {offsets = [0, 64], sizes = [2, 64], strides = [1, 1]} : vector<2x256xf32> to vector<2x64xf32>
    %23 = vector.extract_strided_slice %20 {offsets = [0, 128], sizes = [2, 64], strides = [1, 1]} : vector<2x256xf32> to vector<2x64xf32>
    %cst_10 = arith.constant 2.000000e+00 : f32
    %24 = vector.broadcast %cst_10 : f32 to vector<2x64xf32>
    %25 = arith.mulf %24, %23 : vector<2x64xf32>
    %cst_11 = arith.constant 1.000000e+00 : f32
    %26 = vector.broadcast %cst_11 : f32 to vector<2x64xf32>
    %27 = arith.subf %25, %26 : vector<2x64xf32>
    %28 = vector.extract_strided_slice %20 {offsets = [0, 192], sizes = [2, 64], strides = [1, 1]} : vector<2x256xf32> to vector<2x64xf32>
    %29 = arith.mulf %22, %9 : vector<2x64xf32>
    %30 = arith.mulf %21, %27 : vector<2x64xf32>
    %31 = arith.addf %29, %30 : vector<2x64xf32>
    %32 = math.tanh %31 : vector<2x64xf32>
    %33 = arith.mulf %28, %32 : vector<2x64xf32>
    %cst_12 = arith.constant 0.000000e+00 : f32
    %34 = vector.broadcast %cst_12 : f32 to vector<2x64xf32>
    %35 = arith.select %12, %33, %34 : vector<2x64xi1>, vector<2x64xf32>
    %cst_13 = arith.constant 0.000000e+00 : f32
    %36 = vector.broadcast %cst_13 : f32 to vector<2x64xf32>
    %37 = arith.select %12, %31, %36 : vector<2x64xi1>, vector<2x64xf32>
    %38 = vector.extract_strided_slice %8 {offsets = [2, 0], sizes = [2, 256], strides = [1, 1]} : vector<16x256xf32> to vector<2x256xf32>
    %cst_14 = arith.constant dense<0.000000e+00> : vector<2x256xf32>
    %39 = tpu.matmul %35, %4, %cst_14 {dimension_numbers = #tpu.dot_dimension_numbers<[1], [0], [0], [1], [0, 0, 1, 1], [], []>} : vector<2x64xf32>, vector<64x256xf32>, vector<2x256xf32> -> vector<2x256xf32>
    %40 = arith.addf %39, %38 : vector<2x256xf32>
    %41 = arith.negf %40 : vector<2x256xf32>
    %42 = math.exp %41 : vector<2x256xf32>
    %cst_15 = arith.constant 1.000000e+00 : f32
    %43 = vector.broadcast %cst_15 : f32 to vector<2x256xf32>
    %44 = arith.addf %43, %42 : vector<2x256xf32>
    %45 = arith.divf %43, %44 : vector<2x256xf32>
    %46 = vector.extract_strided_slice %45 {offsets = [0, 0], sizes = [2, 64], strides = [1, 1]} : vector<2x256xf32> to vector<2x64xf32>
    %47 = vector.extract_strided_slice %45 {offsets = [0, 64], sizes = [2, 64], strides = [1, 1]} : vector<2x256xf32> to vector<2x64xf32>
    %48 = vector.extract_strided_slice %45 {offsets = [0, 128], sizes = [2, 64], strides = [1, 1]} : vector<2x256xf32> to vector<2x64xf32>
    %cst_16 = arith.constant 2.000000e+00 : f32
    %49 = vector.broadcast %cst_16 : f32 to vector<2x64xf32>
    %50 = arith.mulf %49, %48 : vector<2x64xf32>
    %cst_17 = arith.constant 1.000000e+00 : f32
    %51 = vector.broadcast %cst_17 : f32 to vector<2x64xf32>
    %52 = arith.subf %50, %51 : vector<2x64xf32>
    %53 = vector.extract_strided_slice %45 {offsets = [0, 192], sizes = [2, 64], strides = [1, 1]} : vector<2x256xf32> to vector<2x64xf32>
    %54 = arith.mulf %47, %37 : vector<2x64xf32>
    %55 = arith.mulf %46, %52 : vector<2x64xf32>
    %56 = arith.addf %54, %55 : vector<2x64xf32>
    %57 = math.tanh %56 : vector<2x64xf32>
    %58 = arith.mulf %53, %57 : vector<2x64xf32>
    %59 = vector.extract_strided_slice %8 {offsets = [4, 0], sizes = [2, 256], strides = [1, 1]} : vector<16x256xf32> to vector<2x256xf32>
    %cst_18 = arith.constant dense<0.000000e+00> : vector<2x256xf32>
    %60 = tpu.matmul %58, %4, %cst_18 {dimension_numbers = #tpu.dot_dimension_numbers<[1], [0], [0], [1], [0, 0, 1, 1], [], []>} : vector<2x64xf32>, vector<64x256xf32>, vector<2x256xf32> -> vector<2x256xf32>
    %61 = arith.addf %60, %59 : vector<2x256xf32>
    %62 = arith.negf %61 : vector<2x256xf32>
    %63 = math.exp %62 : vector<2x256xf32>
    %cst_19 = arith.constant 1.000000e+00 : f32
    %64 = vector.broadcast %cst_19 : f32 to vector<2x256xf32>
    %65 = arith.addf %64, %63 : vector<2x256xf32>
    %66 = arith.divf %64, %65 : vector<2x256xf32>
    %67 = vector.extract_strided_slice %66 {offsets = [0, 0], sizes = [2, 64], strides = [1, 1]} : vector<2x256xf32> to vector<2x64xf32>
    %68 = vector.extract_strided_slice %66 {offsets = [0, 64], sizes = [2, 64], strides = [1, 1]} : vector<2x256xf32> to vector<2x64xf32>
    %69 = vector.extract_strided_slice %66 {offsets = [0, 128], sizes = [2, 64], strides = [1, 1]} : vector<2x256xf32> to vector<2x64xf32>
    %cst_20 = arith.constant 2.000000e+00 : f32
    %70 = vector.broadcast %cst_20 : f32 to vector<2x64xf32>
    %71 = arith.mulf %70, %69 : vector<2x64xf32>
    %cst_21 = arith.constant 1.000000e+00 : f32
    %72 = vector.broadcast %cst_21 : f32 to vector<2x64xf32>
    %73 = arith.subf %71, %72 : vector<2x64xf32>
    %74 = vector.extract_strided_slice %66 {offsets = [0, 192], sizes = [2, 64], strides = [1, 1]} : vector<2x256xf32> to vector<2x64xf32>
    %75 = arith.mulf %68, %56 : vector<2x64xf32>
    %76 = arith.mulf %67, %73 : vector<2x64xf32>
    %77 = arith.addf %75, %76 : vector<2x64xf32>
    %78 = math.tanh %77 : vector<2x64xf32>
    %79 = arith.mulf %74, %78 : vector<2x64xf32>
    %80 = vector.extract_strided_slice %8 {offsets = [6, 0], sizes = [2, 256], strides = [1, 1]} : vector<16x256xf32> to vector<2x256xf32>
    %cst_22 = arith.constant dense<0.000000e+00> : vector<2x256xf32>
    %81 = tpu.matmul %79, %4, %cst_22 {dimension_numbers = #tpu.dot_dimension_numbers<[1], [0], [0], [1], [0, 0, 1, 1], [], []>} : vector<2x64xf32>, vector<64x256xf32>, vector<2x256xf32> -> vector<2x256xf32>
    %82 = arith.addf %81, %80 : vector<2x256xf32>
    %83 = arith.negf %82 : vector<2x256xf32>
    %84 = math.exp %83 : vector<2x256xf32>
    %cst_23 = arith.constant 1.000000e+00 : f32
    %85 = vector.broadcast %cst_23 : f32 to vector<2x256xf32>
    %86 = arith.addf %85, %84 : vector<2x256xf32>
    %87 = arith.divf %85, %86 : vector<2x256xf32>
    %88 = vector.extract_strided_slice %87 {offsets = [0, 0], sizes = [2, 64], strides = [1, 1]} : vector<2x256xf32> to vector<2x64xf32>
    %89 = vector.extract_strided_slice %87 {offsets = [0, 64], sizes = [2, 64], strides = [1, 1]} : vector<2x256xf32> to vector<2x64xf32>
    %90 = vector.extract_strided_slice %87 {offsets = [0, 128], sizes = [2, 64], strides = [1, 1]} : vector<2x256xf32> to vector<2x64xf32>
    %cst_24 = arith.constant 2.000000e+00 : f32
    %91 = vector.broadcast %cst_24 : f32 to vector<2x64xf32>
    %92 = arith.mulf %91, %90 : vector<2x64xf32>
    %cst_25 = arith.constant 1.000000e+00 : f32
    %93 = vector.broadcast %cst_25 : f32 to vector<2x64xf32>
    %94 = arith.subf %92, %93 : vector<2x64xf32>
    %95 = vector.extract_strided_slice %87 {offsets = [0, 192], sizes = [2, 64], strides = [1, 1]} : vector<2x256xf32> to vector<2x64xf32>
    %96 = arith.mulf %89, %77 : vector<2x64xf32>
    %97 = arith.mulf %88, %94 : vector<2x64xf32>
    %98 = arith.addf %96, %97 : vector<2x64xf32>
    %99 = math.tanh %98 : vector<2x64xf32>
    %100 = arith.mulf %95, %99 : vector<2x64xf32>
    %101 = vector.extract_strided_slice %8 {offsets = [8, 0], sizes = [2, 256], strides = [1, 1]} : vector<16x256xf32> to vector<2x256xf32>
    %cst_26 = arith.constant dense<0.000000e+00> : vector<2x256xf32>
    %102 = tpu.matmul %100, %4, %cst_26 {dimension_numbers = #tpu.dot_dimension_numbers<[1], [0], [0], [1], [0, 0, 1, 1], [], []>} : vector<2x64xf32>, vector<64x256xf32>, vector<2x256xf32> -> vector<2x256xf32>
    %103 = arith.addf %102, %101 : vector<2x256xf32>
    %104 = arith.negf %103 : vector<2x256xf32>
    %105 = math.exp %104 : vector<2x256xf32>
    %cst_27 = arith.constant 1.000000e+00 : f32
    %106 = vector.broadcast %cst_27 : f32 to vector<2x256xf32>
    %107 = arith.addf %106, %105 : vector<2x256xf32>
    %108 = arith.divf %106, %107 : vector<2x256xf32>
    %109 = vector.extract_strided_slice %108 {offsets = [0, 0], sizes = [2, 64], strides = [1, 1]} : vector<2x256xf32> to vector<2x64xf32>
    %110 = vector.extract_strided_slice %108 {offsets = [0, 64], sizes = [2, 64], strides = [1, 1]} : vector<2x256xf32> to vector<2x64xf32>
    %111 = vector.extract_strided_slice %108 {offsets = [0, 128], sizes = [2, 64], strides = [1, 1]} : vector<2x256xf32> to vector<2x64xf32>
    %cst_28 = arith.constant 2.000000e+00 : f32
    %112 = vector.broadcast %cst_28 : f32 to vector<2x64xf32>
    %113 = arith.mulf %112, %111 : vector<2x64xf32>
    %cst_29 = arith.constant 1.000000e+00 : f32
    %114 = vector.broadcast %cst_29 : f32 to vector<2x64xf32>
    %115 = arith.subf %113, %114 : vector<2x64xf32>
    %116 = vector.extract_strided_slice %108 {offsets = [0, 192], sizes = [2, 64], strides = [1, 1]} : vector<2x256xf32> to vector<2x64xf32>
    %117 = arith.mulf %110, %98 : vector<2x64xf32>
    %118 = arith.mulf %109, %115 : vector<2x64xf32>
    %119 = arith.addf %117, %118 : vector<2x64xf32>
    %120 = math.tanh %119 : vector<2x64xf32>
    %121 = arith.mulf %116, %120 : vector<2x64xf32>
    %122 = vector.extract_strided_slice %8 {offsets = [10, 0], sizes = [2, 256], strides = [1, 1]} : vector<16x256xf32> to vector<2x256xf32>
    %cst_30 = arith.constant dense<0.000000e+00> : vector<2x256xf32>
    %123 = tpu.matmul %121, %4, %cst_30 {dimension_numbers = #tpu.dot_dimension_numbers<[1], [0], [0], [1], [0, 0, 1, 1], [], []>} : vector<2x64xf32>, vector<64x256xf32>, vector<2x256xf32> -> vector<2x256xf32>
    %124 = arith.addf %123, %122 : vector<2x256xf32>
    %125 = arith.negf %124 : vector<2x256xf32>
    %126 = math.exp %125 : vector<2x256xf32>
    %cst_31 = arith.constant 1.000000e+00 : f32
    %127 = vector.broadcast %cst_31 : f32 to vector<2x256xf32>
    %128 = arith.addf %127, %126 : vector<2x256xf32>
    %129 = arith.divf %127, %128 : vector<2x256xf32>
    %130 = vector.extract_strided_slice %129 {offsets = [0, 0], sizes = [2, 64], strides = [1, 1]} : vector<2x256xf32> to vector<2x64xf32>
    %131 = vector.extract_strided_slice %129 {offsets = [0, 64], sizes = [2, 64], strides = [1, 1]} : vector<2x256xf32> to vector<2x64xf32>
    %132 = vector.extract_strided_slice %129 {offsets = [0, 128], sizes = [2, 64], strides = [1, 1]} : vector<2x256xf32> to vector<2x64xf32>
    %cst_32 = arith.constant 2.000000e+00 : f32
    %133 = vector.broadcast %cst_32 : f32 to vector<2x64xf32>
    %134 = arith.mulf %133, %132 : vector<2x64xf32>
    %cst_33 = arith.constant 1.000000e+00 : f32
    %135 = vector.broadcast %cst_33 : f32 to vector<2x64xf32>
    %136 = arith.subf %134, %135 : vector<2x64xf32>
    %137 = vector.extract_strided_slice %129 {offsets = [0, 192], sizes = [2, 64], strides = [1, 1]} : vector<2x256xf32> to vector<2x64xf32>
    %138 = arith.mulf %131, %119 : vector<2x64xf32>
    %139 = arith.mulf %130, %136 : vector<2x64xf32>
    %140 = arith.addf %138, %139 : vector<2x64xf32>
    %141 = math.tanh %140 : vector<2x64xf32>
    %142 = arith.mulf %137, %141 : vector<2x64xf32>
    %143 = vector.extract_strided_slice %8 {offsets = [12, 0], sizes = [2, 256], strides = [1, 1]} : vector<16x256xf32> to vector<2x256xf32>
    %cst_34 = arith.constant dense<0.000000e+00> : vector<2x256xf32>
    %144 = tpu.matmul %142, %4, %cst_34 {dimension_numbers = #tpu.dot_dimension_numbers<[1], [0], [0], [1], [0, 0, 1, 1], [], []>} : vector<2x64xf32>, vector<64x256xf32>, vector<2x256xf32> -> vector<2x256xf32>
    %145 = arith.addf %144, %143 : vector<2x256xf32>
    %146 = arith.negf %145 : vector<2x256xf32>
    %147 = math.exp %146 : vector<2x256xf32>
    %cst_35 = arith.constant 1.000000e+00 : f32
    %148 = vector.broadcast %cst_35 : f32 to vector<2x256xf32>
    %149 = arith.addf %148, %147 : vector<2x256xf32>
    %150 = arith.divf %148, %149 : vector<2x256xf32>
    %151 = vector.extract_strided_slice %150 {offsets = [0, 0], sizes = [2, 64], strides = [1, 1]} : vector<2x256xf32> to vector<2x64xf32>
    %152 = vector.extract_strided_slice %150 {offsets = [0, 64], sizes = [2, 64], strides = [1, 1]} : vector<2x256xf32> to vector<2x64xf32>
    %153 = vector.extract_strided_slice %150 {offsets = [0, 128], sizes = [2, 64], strides = [1, 1]} : vector<2x256xf32> to vector<2x64xf32>
    %cst_36 = arith.constant 2.000000e+00 : f32
    %154 = vector.broadcast %cst_36 : f32 to vector<2x64xf32>
    %155 = arith.mulf %154, %153 : vector<2x64xf32>
    %cst_37 = arith.constant 1.000000e+00 : f32
    %156 = vector.broadcast %cst_37 : f32 to vector<2x64xf32>
    %157 = arith.subf %155, %156 : vector<2x64xf32>
    %158 = vector.extract_strided_slice %150 {offsets = [0, 192], sizes = [2, 64], strides = [1, 1]} : vector<2x256xf32> to vector<2x64xf32>
    %159 = arith.mulf %152, %140 : vector<2x64xf32>
    %160 = arith.mulf %151, %157 : vector<2x64xf32>
    %161 = arith.addf %159, %160 : vector<2x64xf32>
    %162 = math.tanh %161 : vector<2x64xf32>
    %163 = arith.mulf %158, %162 : vector<2x64xf32>
    %164 = vector.extract_strided_slice %8 {offsets = [14, 0], sizes = [2, 256], strides = [1, 1]} : vector<16x256xf32> to vector<2x256xf32>
    %cst_38 = arith.constant dense<0.000000e+00> : vector<2x256xf32>
    %165 = tpu.matmul %163, %4, %cst_38 {dimension_numbers = #tpu.dot_dimension_numbers<[1], [0], [0], [1], [0, 0, 1, 1], [], []>} : vector<2x64xf32>, vector<64x256xf32>, vector<2x256xf32> -> vector<2x256xf32>
    %166 = arith.addf %165, %164 : vector<2x256xf32>
    %167 = arith.negf %166 : vector<2x256xf32>
    %168 = math.exp %167 : vector<2x256xf32>
    %cst_39 = arith.constant 1.000000e+00 : f32
    %169 = vector.broadcast %cst_39 : f32 to vector<2x256xf32>
    %170 = arith.addf %169, %168 : vector<2x256xf32>
    %171 = arith.divf %169, %170 : vector<2x256xf32>
    %172 = vector.extract_strided_slice %171 {offsets = [0, 0], sizes = [2, 64], strides = [1, 1]} : vector<2x256xf32> to vector<2x64xf32>
    %173 = vector.extract_strided_slice %171 {offsets = [0, 64], sizes = [2, 64], strides = [1, 1]} : vector<2x256xf32> to vector<2x64xf32>
    %174 = vector.extract_strided_slice %171 {offsets = [0, 128], sizes = [2, 64], strides = [1, 1]} : vector<2x256xf32> to vector<2x64xf32>
    %cst_40 = arith.constant 2.000000e+00 : f32
    %175 = vector.broadcast %cst_40 : f32 to vector<2x64xf32>
    %176 = arith.mulf %175, %174 : vector<2x64xf32>
    %cst_41 = arith.constant 1.000000e+00 : f32
    %177 = vector.broadcast %cst_41 : f32 to vector<2x64xf32>
    %178 = arith.subf %176, %177 : vector<2x64xf32>
    %179 = vector.extract_strided_slice %171 {offsets = [0, 192], sizes = [2, 64], strides = [1, 1]} : vector<2x256xf32> to vector<2x64xf32>
    %180 = arith.mulf %173, %161 : vector<2x64xf32>
    %181 = arith.mulf %172, %178 : vector<2x64xf32>
    %182 = arith.addf %180, %181 : vector<2x64xf32>
    %183 = math.tanh %182 : vector<2x64xf32>
    %184 = arith.mulf %179, %183 : vector<2x64xf32>
    %cst_42 = arith.constant dense<0.000000e+00> : vector<2x256xf32>
    %185 = tpu.matmul %184, %4, %cst_42 {dimension_numbers = #tpu.dot_dimension_numbers<[1], [0], [0], [1], [0, 0, 1, 1], [], []>} : vector<2x64xf32>, vector<64x256xf32>, vector<2x256xf32> -> vector<2x256xf32>
    %186 = vector.broadcast %5 : vector<1x256xf32> to vector<2x256xf32>
    %187 = arith.addf %185, %186 : vector<2x256xf32>
    %188 = arith.negf %187 : vector<2x256xf32>
    %189 = math.exp %188 : vector<2x256xf32>
    %cst_43 = arith.constant 1.000000e+00 : f32
    %190 = vector.broadcast %cst_43 : f32 to vector<2x256xf32>
    %191 = arith.addf %190, %189 : vector<2x256xf32>
    %192 = arith.divf %190, %191 : vector<2x256xf32>
    %193 = vector.extract_strided_slice %192 {offsets = [0, 0], sizes = [2, 64], strides = [1, 1]} : vector<2x256xf32> to vector<2x64xf32>
    %194 = vector.extract_strided_slice %192 {offsets = [0, 64], sizes = [2, 64], strides = [1, 1]} : vector<2x256xf32> to vector<2x64xf32>
    %195 = vector.extract_strided_slice %192 {offsets = [0, 128], sizes = [2, 64], strides = [1, 1]} : vector<2x256xf32> to vector<2x64xf32>
    %cst_44 = arith.constant 2.000000e+00 : f32
    %196 = vector.broadcast %cst_44 : f32 to vector<2x64xf32>
    %197 = arith.mulf %196, %195 : vector<2x64xf32>
    %cst_45 = arith.constant 1.000000e+00 : f32
    %198 = vector.broadcast %cst_45 : f32 to vector<2x64xf32>
    %199 = arith.subf %197, %198 : vector<2x64xf32>
    %200 = vector.extract_strided_slice %192 {offsets = [0, 192], sizes = [2, 64], strides = [1, 1]} : vector<2x256xf32> to vector<2x64xf32>
    %201 = arith.mulf %194, %182 : vector<2x64xf32>
    %202 = arith.mulf %193, %199 : vector<2x64xf32>
    %203 = arith.addf %201, %202 : vector<2x64xf32>
    %204 = math.tanh %203 : vector<2x64xf32>
    %205 = arith.mulf %200, %204 : vector<2x64xf32>
    %206 = vector.extract_strided_slice %205 {offsets = [0, 32], sizes = [2, 32], strides = [1, 1]} : vector<2x64xf32> to vector<2x32xf32>
    %c0_46 = arith.constant 0 : index
    %c0_47 = arith.constant 0 : index
    %207 = vector.load %arg4[%c0_46, %c0_47] : memref<32x384xbf16, #tpu.memory_space<vmem>>, vector<32x384xbf16>
    %208 = arith.extf %207 : vector<32x384xbf16> to vector<32x384xf32>
    %cst_48 = arith.constant dense<0.000000e+00> : vector<2x384xf32>
    %209 = tpu.matmul %206, %208, %cst_48 {dimension_numbers = #tpu.dot_dimension_numbers<[1], [0], [0], [1], [0, 0, 1, 1], [], []>} : vector<2x32xf32>, vector<32x384xf32>, vector<2x384xf32> -> vector<2x384xf32>
    %c0_49 = arith.constant 0 : index
    %c0_50 = arith.constant 0 : index
    %210 = vector.load %arg5[%c0_49, %c0_50] : memref<1x384xf32, #tpu.memory_space<vmem>>, vector<1x384xf32>
    %211 = vector.broadcast %210 : vector<1x384xf32> to vector<2x384xf32>
    %212 = arith.addf %209, %211 : vector<2x384xf32>
    %cst_51 = arith.constant 0.000000e+00 : f32
    %213 = vector.broadcast %cst_51 : f32 to vector<2x384xf32>
    %214 = arith.maximumf %212, %213 : vector<2x384xf32>
    %c0_52 = arith.constant 0 : index
    %c0_53 = arith.constant 0 : index
    %215 = vector.load %arg6[%c0_52, %c0_53] : memref<384x256xbf16, #tpu.memory_space<vmem>>, vector<384x256xbf16>
    %216 = arith.extf %215 : vector<384x256xbf16> to vector<384x256xf32>
    %cst_54 = arith.constant dense<0.000000e+00> : vector<2x256xf32>
    %217 = tpu.matmul %214, %216, %cst_54 {dimension_numbers = #tpu.dot_dimension_numbers<[1], [0], [0], [1], [0, 0, 1, 1], [], []>} : vector<2x384xf32>, vector<384x256xf32>, vector<2x256xf32> -> vector<2x256xf32>
    %c0_55 = arith.constant 0 : index
    %c0_56 = arith.constant 0 : index
    %218 = vector.load %arg7[%c0_55, %c0_56] : memref<1x256xf32, #tpu.memory_space<vmem>>, vector<1x256xf32>
    %219 = vector.broadcast %218 : vector<1x256xf32> to vector<2x256xf32>
    %220 = arith.addf %217, %219 : vector<2x256xf32>
    %cst_57 = arith.constant 0.000000e+00 : f32
    %221 = vector.broadcast %cst_57 : f32 to vector<2x256xf32>
    %222 = arith.maximumf %220, %221 : vector<2x256xf32>
    %c0_58 = arith.constant 0 : index
    %c0_59 = arith.constant 0 : index
    %223 = vector.load %arg8[%c0_58, %c0_59] : memref<256x128xbf16, #tpu.memory_space<vmem>>, vector<256x128xbf16>
    %224 = arith.extf %223 : vector<256x128xbf16> to vector<256x128xf32>
    %cst_60 = arith.constant dense<0.000000e+00> : vector<2x128xf32>
    %225 = tpu.matmul %222, %224, %cst_60 {dimension_numbers = #tpu.dot_dimension_numbers<[1], [0], [0], [1], [0, 0, 1, 1], [], []>} : vector<2x256xf32>, vector<256x128xf32>, vector<2x128xf32> -> vector<2x128xf32>
    %c0_61 = arith.constant 0 : index
    %c0_62 = arith.constant 0 : index
    %226 = vector.load %arg9[%c0_61, %c0_62] : memref<1x128xf32, #tpu.memory_space<vmem>>, vector<1x128xf32>
    %227 = vector.broadcast %226 : vector<1x128xf32> to vector<2x128xf32>
    %228 = arith.addf %225, %227 : vector<2x128xf32>
    %cst_63 = arith.constant 0.000000e+00 : f32
    %229 = vector.broadcast %cst_63 : f32 to vector<2x128xf32>
    %230 = arith.maximumf %228, %229 : vector<2x128xf32>
    %c0_64 = arith.constant 0 : index
    %c0_65 = arith.constant 0 : index
    %231 = vector.load %arg10[%c0_64, %c0_65] : memref<128x1xbf16, #tpu.memory_space<vmem>>, vector<128x1xbf16>
    %232 = arith.extf %231 : vector<128x1xbf16> to vector<128x1xf32>
    %cst_66 = arith.constant dense<0.000000e+00> : vector<2x1xf32>
    %233 = tpu.matmul %230, %232, %cst_66 {dimension_numbers = #tpu.dot_dimension_numbers<[1], [0], [0], [1], [0, 0, 1, 1], [], []>} : vector<2x128xf32>, vector<128x1xf32>, vector<2x1xf32> -> vector<2x1xf32>
    %c0_67 = arith.constant 0 : index
    %c0_68 = arith.constant 0 : index
    %234 = vector.load %arg11[%c0_67, %c0_68] : memref<1x1xf32, #tpu.memory_space<vmem>>, vector<1x1xf32>
    %235 = vector.broadcast %234 : vector<1x1xf32> to vector<2x1xf32>
    %236 = arith.addf %233, %235 : vector<2x1xf32>
    %c0_69 = arith.constant 0 : index
    %c0_70 = arith.constant 0 : index
    %237 = vector.load %arg12[%c0_69, %c0_70] : memref<2x1xf32, #tpu.memory_space<vmem>>, vector<2x1xf32>
    tpu.vector_store %arg12[%c0_69, %c0_70], %236 {strides = array<i32>} : memref<2x1xf32, #tpu.memory_space<vmem>>, vector<2x1xf32>,
    return
  }
}

</mosaic_0001>

<bundles_post_ra>
// kernel: _lambda_.1
= control target key start
LH: loop header
LB: loop body
LE: loop exit
PB: predicated region body
PF: predicated region fallthrough
CT: control target
= control target key end

     0   :  { %v2742_v1 = vmov 0.0   ;;  %vm92_vm0 = vcmask 1043456   ;;  %vm85_vm1 = vcmask 31744   ;;  %v73_v14 = vlaneseq  ;;  %s2745_s21 = smov 32   ;;  %s3297_s1 = inlined_call_operand.vmem [shape: bf16[4,256], index: 1, kind: input, shape index: {}]   ;;  %s3298_s2 = inlined_call_operand.vmem [shape: bf16[64,256], index: 2, kind: input, shape index: {}]   ;;  %s3299_s0 = inlined_call_operand.vmem [shape: f32[16,4], index: 0, kind: input, shape index: {}]   ;;  %s3300_s3 = inlined_call_operand.vmem [shape: f32[1,256], index: 3, kind: input, shape index: {}]   ;;  %s3301_s4 = inlined_call_operand.vmem [shape: bf16[32,384], index: 4, kind: input, shape index: {}]   ;;  %s3302_s6 = inlined_call_operand.vmem [shape: bf16[384,256], index: 6, kind: input, shape index: {}]   ;;  %s3303_s8 = inlined_call_operand.vmem [shape: bf16[256,128], index: 8, kind: input, shape index: {}]   ;;  %s3304_s5 = inlined_call_operand.vmem [shape: f32[1,384], index: 5, kind: input, shape index: {}]   ;;  %s3305_s7 = inlined_call_operand.vmem [shape: f32[1,256], index: 7, kind: input, shape index: {}]   ;;  %s3306_s10 = inlined_call_operand.vmem [shape: bf16[128,1], index: 10, kind: input, shape index: {}]   ;;  %s3307_s11 = inlined_call_operand.<no memory space> [shape: f32[1,1], index: 11, kind: input, shape index: {}]   ;;  %s3308_s9 = inlined_call_operand.vmem [shape: f32[1,128], index: 9, kind: input, shape index: {}]   ;;  %s3309_s12 = inlined_call_operand.vmem [shape: f32[2,1], index: 12, kind: output, shape index: {}]  }
   0x1   :  { %v45_v0 = vld [vmem:[%s3297_s1] sm:$0xf]  ;;  %161 = vmatprep.mubr.f32.mxu0 %v2742_v1  ;;  %465 = vmatprep.mubr.f32.mxu1 %v2742_v1  ;;  %v2820_v3 = vld [vmem:[%s3298_s2 + $0x4] ss:$8 sps:$4 sm:$0xff]   ;;  %v2830_v6 = vld [vmem:[%s3298_s2 + $0x14] ss:$8 sps:$4 sm:$0xff]  }
   0x2   :  { %v46_v2 = vunpack.c.l.bf16 %v45_v0  ;;  %v2825_v4 = vld [vmem:[%s3298_s2] ss:$8 sps:$4 sm:$0xff]   ;;  %2148 = vmatprep.subr.bf16.mxu1 %v2820_v3  ;;  %v2843_v8 = vld [vmem:[%s3298_s2 + $0x10] ss:$8 sps:$4 sm:$0xff]   ;;  %v2849_v9 = vld [vmem:[%s3298_s2 + $0x24] ss:$8 sps:$4 sm:$0xff]  }
   0x3   :  { %v43_v7 = vld [vmem:[%s3299_s0] sm:$0xff]  ;;  %2150 = vmatpush1.bf16.msra.mxu1 %v2825_v4  ;;  %v44_v10 = vld [vmem:[%s3299_s0 + $0x8] sm:$0xff]  ;;  %v2868_v12 = vld [vmem:[%s3298_s2 + $0x34] ss:$8 sps:$4 sm:$0xff]   ;;  %v2895_v17 = vshrl.u32 %v73_v14, 7  ;;  %v175_v47 = vand.u32 127, %v73_v14 }
   0x4   :  { %v84_v5 = vcombine.high %v46_v2, %v46_v2  ;;  %2152 = vmatprep.subr.bf16.mxu1 %v2830_v6  ;;  %v2861_v11 = vld [vmem:[%s3298_s2 + $0x20] ss:$8 sps:$4 sm:$0xff]   ;;  %v2877_v13 = vld [vmem:[%s3298_s2 + $0x30] ss:$8 sps:$4 sm:$0xff]   ;;  %vm177_vm3 = vcmask 523264   ;;  %vm1147_vm4 = vcmask 261120  }
   0x5   :  { %v2902_v20 = vsub.s32 0, %v2895_v17  ;;  %v71_v21 = vld [vmem:[%s3300_s3] sm:$0x3]  ;;  %v2908_v22 = vsub.s32 1, %v2895_v17  ;;  %s2743_s3 = smov 64   ;;  %vm176_vm2 = vcmp.lt.s32.totalorder %v175_v47, 32 }
   0x6   :  { %1851 = vmatprep.subr.msk.mxu0 %vm92_vm0, %v84_v5  ;;  %vm2746_vm5 = vmmov 0   ;;  %vm1845_vm6 = vcmask 1024  }
   0x7   :  { %1852 = vmatpush1.msk.msra.mxu0 %vm92_vm0, %v46_v2  ;;  %2154 = vmatpush1.bf16.msra.mxu1 %v2843_v8  ;;  %v2911_v23 = vrot.slane %v71_v21, %v2902_v20  ;;  %v2914_v24 = vrot.slane %v71_v21, %v2908_v22 }
   0x8   :  { %1853 = vmatmul.mubr.msk.f32.vlgmr.msra.gmra.mrb[0].mxu0 %vm85_vm1, %v43_v7  ;;  %2116 = vmatprep.subr.bf16.mxu0 %v2820_v3 }
   0x9   :  { %2118 = vmatpush1.bf16.msra.mxu0 %v2825_v4  ;;  %167 = vmatprep.mubr.f32.mxu0 %v2742_v1 }
   0xa   :  { %2120 = vmatprep.subr.bf16.mxu0 %v2830_v6  ;;  %2156 = vmatprep.subr.bf16.mxu1 %v2849_v9 }
   0xb   :  { %2158 = vmatpush1.bf16.msra.mxu1 %v2861_v11 }
   0xc   :  { %1854 = vmatmul.mubr.msk.f32.gmra.mrb[2].mxu0 %vm85_vm1, %v44_v10  ;;  %2160 = vmatprep.subr.bf16.mxu1 %v2868_v12 }
   0xd   :  { %2122 = vmatpush1.bf16.msra.mxu0 %v2843_v8  ;;  %245 = vmatprep.mubr.f32.mxu0 %v2742_v1 }
   0xe   :  { %2124 = vmatprep.subr.bf16.mxu0 %v2849_v9 }
   0xf   :  { %2162 = vmatpush1.bf16.msra.mxu1 %v2877_v13 }
  0x10   :  { %2180 = vmatprep.subr.bf16.mxu1 %v2820_v3 }
  0x11   :  { %2126 = vmatpush1.bf16.msra.mxu0 %v2861_v11 }
  0x12   :  { %2128 = vmatprep.subr.bf16.mxu0 %v2868_v12 }
  0x15   :  { %2130 = vmatpush1.bf16.msra.mxu0 %v2877_v13 }
  0x16   :  { %2132 = vmatprep.subr.bf16.mxu0 %v2820_v3 }
  0x18   :  { %246 = vmatmul.mubr.f32.vlgmr.msra.gmra.mrb[4].mxu0 %v2742_v1 }
  0x19   :  { %2134 = vmatpush1.bf16.msra.mxu0 %v2825_v4  ;;  %358 = vmatprep.mubr.f32.mxu0 %v2742_v1 }
  0x1a   :  { %2136 = vmatprep.subr.bf16.mxu0 %v2830_v6 }
  0x1d   :  { %2138 = vmatpush1.bf16.msra.mxu0 %v2843_v8 }
  0x1e   :  { %2140 = vmatprep.subr.bf16.mxu0 %v2849_v9 }
  0x21   :  { %2142 = vmatpush1.bf16.msra.mxu0 %v2861_v11 }
  0x22   :  { %2144 = vmatprep.subr.bf16.mxu0 %v2868_v12 }
  0x25   :  { %2146 = vmatpush1.bf16.msra.mxu0 %v2877_v13 }
  0x26   :  { %2164 = vmatprep.subr.bf16.mxu0 %v2820_v3 }
  0xdb   :  { %v163_v15 = vpop.f32.mrb[0].mxu0 }
  0xdc   :  { %v165_v16 = vpop.f32.mrb[1].mxu0  ;;  %v2917_v25 = vadd.f32 %v163_v15, %v2911_v23 }
  0xdd   :  { %v2920_v26 = vadd.f32 %v165_v16, %v2914_v24 }
  0xde   :  { %v287_v52 = vrot.slane %v2917_v25, 2 }
  0xdf   :  { %v2897_v18 = vpop.f32.mrb[2].mxu0  ;;  %v288_v54 = vrot.slane %v2920_v26, 2 }
  0xe0   :  { %v2899_v19 = vpop.f32.mrb[3].mxu0 }
  0xeb   :  { %v247_v27 = vpop.f32.mrb[4].mxu0 }
  0xec   :  { %v248_v28 = vadd.f32 %v247_v27, %v2917_v25  ;;  %v249_v29 = vpop.f32.mrb[5].mxu0 }
  0xed   :  { %v250_v30 = vadd.f32 %v249_v29, %v2920_v26 }
  0xee   :  { %v1855_v31 = vmul.f32 -1.442695, %v248_v28 }
  0xef   :  { %v1856_v32 = vmul.f32 -1.442695, %v250_v30  ;;  %v395_v30 = vrot.slane %v2917_v25, 4 }
  0xf0   :  { %2652 = vpow2.f32 %v1855_v31 }
  0xf1   :  { %2654 = vpow2.f32 %v1856_v32  ;;  %v396_v32 = vrot.slane %v2920_v26, 4 }
  0xfa   :  { %v2653_v33 = vpop.eup %2652 }
  0xfb   :  { %v2655_v34 = vpop.eup %2654  ;;  %v258_v36 = vadd.f32 1.0, %v2653_v33 }
  0xfc   :  { %v259_v35 = vadd.f32 1.0, %v2655_v34 }
  0xfe   :  { %2656 = vrcp.f32 %v259_v35 }
  0xff   :  { %2658 = vrcp.f32 %v258_v36 }
 0x108   :  { %v2657_v37 = vpop.eup %2656 }
 0x109   :  { %v264_v38 = vmul.f32 2.0, %v2657_v37  ;;  %v2659_v40 = vpop.eup %2658 }
 0x10a   :  { %v266_v42 = vmul.f32 0.0, %v2659_v40 }
 0x10b   :  { %v1857_v39 = vadd.f32 -1.0, %v264_v38 }
 0x10d   :  { %v267_v41 = vmul.f32 %v2659_v40, %v1857_v39 }
 0x10f   :  { %269 = vrot.lane.b32.xlu0 %v267_v41, %s2743_s3 }
 0x181   :  { %v270_v43 = vpop.permute.xlu0 %269 }
 0x182   :  { %v272_v44 = vadd.f32 %v270_v43, %v266_v42 }
 0x184   :  { %2660 = vtanh.f32 %v272_v44  ;;  %281 = vrot.lane.b32.xlu1 %v272_v44, %s2743_s3 }
 0x18e   :  { %v2661_v45 = vpop.eup %2660 }
 0x18f   :  { %v274_v46 = vmul.f32 %v2661_v45, %v2657_v37 }
 0x191   :  { %276 = vrot.lane.b32.xlu0 %v274_v46, %s2743_s3 }
 0x1f6   :  { %v282_v48 = vpop.permute.xlu1 %281 }
 0x1f7   :  { %v284_v49 = vsel %vm176_vm2, %v282_v48, 0.0 }
 0x1f8   :  { %380 = vrot.lane.b32.xlu1 %v284_v49, %s2743_s3 }
 0x203   :  { %v277_v50 = vpop.permute.xlu0 %276 }
 0x204   :  { %v279_v51 = vsel %vm176_vm2, %v277_v50, 0.0 }
 0x205   :  { %1858 = vmatmul.mubr.msk.f32.vlgmr.msra.gmra.mrb[6].mxu0 %vm177_vm3, %v279_v51 }
 0x206   :  { %2166 = vmatpush1.bf16.msra.mxu0 %v2825_v4  ;;  %568 = vmatprep.mubr.f32.mxu0 %v2742_v1 }
 0x207   :  { %2168 = vmatprep.subr.bf16.mxu0 %v2830_v6 }
 0x20a   :  { %2170 = vmatpush1.bf16.msra.mxu0 %v2843_v8 }
 0x20b   :  { %2172 = vmatprep.subr.bf16.mxu0 %v2849_v9 }
 0x20e   :  { %2174 = vmatpush1.bf16.msra.mxu0 %v2861_v11 }
 0x20f   :  { %2176 = vmatprep.subr.bf16.mxu0 %v2868_v12 }
 0x212   :  { %2178 = vmatpush1.bf16.msra.mxu0 %v2877_v13 }
 0x213   :  { %2196 = vmatprep.subr.bf16.mxu0 %v2820_v3 }
 0x26a   :  { %v381_v14 = vpop.permute.xlu1 %380 }
 0x2d8   :  { %v360_v53 = vpop.f32.mrb[6].mxu0 }
 0x2d9   :  { %v361_v55 = vadd.f32 %v360_v53, %v287_v52  ;;  %v362_v56 = vpop.f32.mrb[7].mxu0  ;;  %v498_v53 = vrot.slane %v2917_v25, 6 }
 0x2da   :  { %v363_v57 = vadd.f32 %v362_v56, %v288_v54 }
 0x2db   :  { %v1859_v58 = vmul.f32 -1.442695, %v361_v55  ;;  %v499_v55 = vrot.slane %v2920_v26, 6 }
 0x2dc   :  { %v1860_v59 = vmul.f32 -1.442695, %v363_v57 }
 0x2dd   :  { %2662 = vpow2.f32 %v1859_v58 }
 0x2de   :  { %2664 = vpow2.f32 %v1860_v59 }
 0x2e7   :  { %v2663_v60 = vpop.eup %2662 }
 0x2e8   :  { %v2665_v61 = vpop.eup %2664  ;;  %v371_v63 = vadd.f32 1.0, %v2663_v60 }
 0x2e9   :  { %v372_v62 = vadd.f32 1.0, %v2665_v61 }
 0x2eb   :  { %2666 = vrcp.f32 %v372_v62 }
 0x2ec   :  { %2668 = vrcp.f32 %v371_v63 }
 0x2f5   :  { %v2667_v0 = vpop.eup %2666 }
 0x2f6   :  { %v377_v2 = vmul.f32 2.0, %v2667_v0  ;;  %v2669_v7 = vpop.eup %2668 }
 0x2f7   :  { %v383_v15 = vmul.f32 %v2669_v7, %v381_v14 }
 0x2f8   :  { %v1861_v5 = vadd.f32 -1.0, %v377_v2 }
 0x2fa   :  { %v384_v10 = vmul.f32 %v2669_v7, %v1861_v5 }
 0x2fc   :  { %386 = vrot.lane.b32.xlu0 %v384_v10, %s2743_s3 }
 0x36e   :  { %v387_v16 = vpop.permute.xlu0 %386 }
 0x36f   :  { %v389_v21 = vadd.f32 %v387_v16, %v383_v15 }
 0x371   :  { %2670 = vtanh.f32 %v389_v21 }
 0x37b   :  { %v2671_v27 = vpop.eup %2670 }
 0x37c   :  { %v391_v28 = vmul.f32 %v2671_v27, %v2667_v0 }
 0x37e   :  { %393 = vrot.lane.b32.xlu1 %v391_v28, %s2743_s3  ;;  %v2982_v28 = vadd.f32 %v2897_v18, %v2911_v23 }
 0x3f0   :  { %v394_v29 = vpop.permute.xlu1 %393 }
 0x3f1   :  { %1862 = vmatmul.mubr.msk.f32.vlgmr.msra.gmra.mrb[0].mxu1 %vm177_vm3, %v394_v29  ;;  %v2986_v29 = vadd.f32 %v2899_v19, %v2914_v24 }
 0x3f2   :  { %2182 = vmatpush1.bf16.msra.mxu1 %v2825_v4  ;;  %667 = vmatprep.mubr.f32.mxu1 %v2742_v1 }
 0x3f3   :  { %2184 = vmatprep.subr.bf16.mxu1 %v2830_v6 }
 0x3f6   :  { %2186 = vmatpush1.bf16.msra.mxu1 %v2843_v8 }
 0x3f7   :  { %2188 = vmatprep.subr.bf16.mxu1 %v2849_v9 }
 0x3fa   :  { %2190 = vmatpush1.bf16.msra.mxu1 %v2861_v11 }
 0x3fb   :  { %2192 = vmatprep.subr.bf16.mxu1 %v2868_v12 }
 0x3fe   :  { %2194 = vmatpush1.bf16.msra.mxu1 %v2877_v13 }
 0x3ff   :  { %2212 = vmatprep.subr.bf16.mxu1 %v2820_v3 }
 0x4c4   :  { %v467_v31 = vpop.f32.mrb[0].mxu1 }
 0x4c5   :  { %v468_v33 = vadd.f32 %v467_v31, %v395_v30  ;;  %v469_v34 = vpop.f32.mrb[1].mxu1 }
 0x4c6   :  { %v470_v35 = vadd.f32 %v469_v34, %v396_v32 }
 0x4c7   :  { %v1863_v36 = vmul.f32 -1.442695, %v468_v33 }
 0x4c8   :  { %v1864_v37 = vmul.f32 -1.442695, %v470_v35 }
 0x4c9   :  { %2672 = vpow2.f32 %v1863_v36 }
 0x4ca   :  { %2674 = vpow2.f32 %v1864_v37 }
 0x4d3   :  { %v2673_v38 = vpop.eup %2672 }
 0x4d4   :  { %v2675_v39 = vpop.eup %2674  ;;  %v478_v41 = vadd.f32 1.0, %v2673_v38 }
 0x4d5   :  { %v479_v40 = vadd.f32 1.0, %v2675_v39 }
 0x4d7   :  { %2676 = vrcp.f32 %v479_v40 }
 0x4d8   :  { %2678 = vrcp.f32 %v478_v41 }
 0x4e1   :  { %v2677_v42 = vpop.eup %2676 }
 0x4e2   :  { %v484_v43 = vmul.f32 2.0, %v2677_v42  ;;  %v2679_v45 = vpop.eup %2678 }
 0x4e3   :  { %v486_v47 = vmul.f32 %v2679_v45, %v389_v21 }
 0x4e4   :  { %v1865_v44 = vadd.f32 -1.0, %v484_v43 }
 0x4e6   :  { %v487_v46 = vmul.f32 %v2679_v45, %v1865_v44 }
 0x4e8   :  { %489 = vrot.lane.b32.xlu0 %v487_v46, %s2743_s3 }
 0x55a   :  { %v490_v48 = vpop.permute.xlu0 %489 }
 0x55b   :  { %v492_v49 = vadd.f32 %v490_v48, %v486_v47  ;;  %v702_v48 = vrot.slane %v2982_v28, 2 }
 0x55d   :  { %2680 = vtanh.f32 %v492_v49 }
 0x567   :  { %v2681_v50 = vpop.eup %2680 }
 0x568   :  { %v494_v51 = vmul.f32 %v2681_v50, %v2677_v42  ;;  %v703_v50 = vrot.slane %v2986_v29, 2 }
 0x56a   :  { %496 = vrot.lane.b32.xlu1 %v494_v51, %s2743_s3 }
 0x5dc   :  { %v497_v52 = vpop.permute.xlu1 %496 }
 0x5dd   :  { %1866 = vmatmul.mubr.msk.f32.vlgmr.msra.gmra.mrb[8].mxu0 %vm177_vm3, %v497_v52 }
 0x5de   :  { %2198 = vmatpush1.bf16.msra.mxu0 %v2825_v4  ;;  %772 = vmatprep.mubr.f32.mxu0 %v2742_v1 }
 0x5df   :  { %2200 = vmatprep.subr.bf16.mxu0 %v2830_v6 }
 0x5e2   :  { %2202 = vmatpush1.bf16.msra.mxu0 %v2843_v8 }
 0x5e3   :  { %2204 = vmatprep.subr.bf16.mxu0 %v2849_v9 }
 0x5e6   :  { %2206 = vmatpush1.bf16.msra.mxu0 %v2861_v11 }
 0x5e7   :  { %2208 = vmatprep.subr.bf16.mxu0 %v2868_v12 }
 0x5ea   :  { %2210 = vmatpush1.bf16.msra.mxu0 %v2877_v13 }
 0x5eb   :  { %2228 = vmatprep.subr.bf16.mxu0 %v2820_v3 }
 0x6b0   :  { %v570_v54 = vpop.f32.mrb[8].mxu0 }
 0x6b1   :  { %v571_v56 = vadd.f32 %v570_v54, %v498_v53  ;;  %v572_v57 = vpop.f32.mrb[9].mxu0 }
 0x6b2   :  { %v573_v58 = vadd.f32 %v572_v57, %v499_v55 }
 0x6b3   :  { %v1867_v59 = vmul.f32 -1.442695, %v571_v56 }
 0x6b4   :  { %v1868_v60 = vmul.f32 -1.442695, %v573_v58 }
 0x6b5   :  { %2682 = vpow2.f32 %v1867_v59 }
 0x6b6   :  { %2684 = vpow2.f32 %v1868_v60 }
 0x6bf   :  { %v2683_v61 = vpop.eup %2682 }
 0x6c0   :  { %v2685_v62 = vpop.eup %2684  ;;  %v581_v0 = vadd.f32 1.0, %v2683_v61 }
 0x6c1   :  { %v582_v63 = vadd.f32 1.0, %v2685_v62 }
 0x6c3   :  { %2686 = vrcp.f32 %v582_v63 }
 0x6c4   :  { %2688 = vrcp.f32 %v581_v0 }
 0x6cd   :  { %v2687_v2 = vpop.eup %2686 }
 0x6ce   :  { %v587_v5 = vmul.f32 2.0, %v2687_v2  ;;  %v2689_v25 = vpop.eup %2688 }
 0x6cf   :  { %v589_v26 = vmul.f32 %v2689_v25, %v492_v49 }
 0x6d0   :  { %v1869_v7 = vadd.f32 -1.0, %v587_v5 }
 0x6d2   :  { %v590_v10 = vmul.f32 %v2689_v25, %v1869_v7 }
 0x6d4   :  { %592 = vrot.lane.b32.xlu0 %v590_v10, %s2743_s3 }
 0x746   :  { %v593_v14 = vpop.permute.xlu0 %592 }
 0x747   :  { %v595_v15 = vadd.f32 %v593_v14, %v589_v26  ;;  %v805_v14 = vrot.slane %v2982_v28, 4 }
 0x749   :  { %2690 = vtanh.f32 %v595_v15 }
 0x753   :  { %v2691_v16 = vpop.eup %2690 }
 0x754   :  { %v597_v21 = vmul.f32 %v2691_v16, %v2687_v2  ;;  %v806_v16 = vrot.slane %v2986_v29, 4 }
 0x756   :  { %599 = vrot.lane.b32.xlu1 %v597_v21, %s2743_s3 }
 0x7c8   :  { %v600_v27 = vpop.permute.xlu1 %599 }
 0x7c9   :  { %1870 = vmatmul.mubr.msk.f32.vlgmr.msra.gmra.mrb[2].mxu1 %vm177_vm3, %v600_v27 }
 0x7ca   :  { %2214 = vmatpush1.bf16.msra.mxu1 %v2825_v4  ;;  %875 = vmatprep.mubr.f32.mxu1 %v2742_v1 }
 0x7cb   :  { %2216 = vmatprep.subr.bf16.mxu1 %v2830_v6 }
 0x7ce   :  { %2218 = vmatpush1.bf16.msra.mxu1 %v2843_v8 }
 0x7cf   :  { %2220 = vmatprep.subr.bf16.mxu1 %v2849_v9 }
 0x7d2   :  { %2222 = vmatpush1.bf16.msra.mxu1 %v2861_v11 }
 0x7d3   :  { %2224 = vmatprep.subr.bf16.mxu1 %v2868_v12 }
 0x7d6   :  { %2226 = vmatpush1.bf16.msra.mxu1 %v2877_v13 }
 0x7d7   :  { %2244 = vmatprep.subr.bf16.mxu1 %v2820_v3 }
 0x89c   :  { %v669_v30 = vpop.f32.mrb[2].mxu1 }
 0x89d   :  { %v670_v31 = vadd.f32 %v669_v30, %v2982_v28  ;;  %v671_v32 = vpop.f32.mrb[3].mxu1 }
 0x89e   :  { %v672_v33 = vadd.f32 %v671_v32, %v2986_v29 }
 0x89f   :  { %v1871_v34 = vmul.f32 -1.442695, %v670_v31 }
 0x8a0   :  { %v1872_v35 = vmul.f32 -1.442695, %v672_v33 }
 0x8a1   :  { %2692 = vpow2.f32 %v1871_v34 }
 0x8a2   :  { %2694 = vpow2.f32 %v1872_v35 }
 0x8ab   :  { %v2693_v36 = vpop.eup %2692 }
 0x8ac   :  { %v2695_v3 = vpop.eup %2694  ;;  %v680_v38 = vadd.f32 1.0, %v2693_v36 }
 0x8ad   :  { %v681_v37 = vadd.f32 1.0, %v2695_v3 }
 0x8af   :  { %2696 = vrcp.f32 %v681_v37 }
 0x8b0   :  { %2698 = vrcp.f32 %v680_v38 }
 0x8b9   :  { %v2697_v18 = vpop.eup %2696 }
 0x8ba   :  { %v686_v39 = vmul.f32 2.0, %v2697_v18  ;;  %v2699_v40 = vpop.eup %2698 }
 0x8bb   :  { %v688_v42 = vmul.f32 %v2699_v40, %v595_v15 }
 0x8bc   :  { %v1873_v19 = vadd.f32 -1.0, %v686_v39  ;;  %v908_v39 = vrot.slane %v2982_v28, 6 }
 0x8be   :  { %v689_v41 = vmul.f32 %v2699_v40, %v1873_v19  ;;  %v909_v40 = vrot.slane %v2986_v29, 6 }
 0x8c0   :  { %691 = vrot.lane.b32.xlu0 %v689_v41, %s2743_s3 }
 0x932   :  { %v692_v43 = vpop.permute.xlu0 %691 }
 0x933   :  { %v694_v44 = vadd.f32 %v692_v43, %v688_v42 }
 0x935   :  { %2700 = vtanh.f32 %v694_v44 }
 0x93f   :  { %v2701_v45 = vpop.eup %2700 }
 0x940   :  { %v696_v46 = vmul.f32 %v2701_v45, %v2697_v18 }
 0x942   :  { %698 = vrot.lane.b32.xlu1 %v696_v46, %s2743_s3 }
 0x9b4   :  { %v699_v47 = vpop.permute.xlu1 %698 }
 0x9b5   :  { %1874 = vmatmul.mubr.msk.f32.vlgmr.msra.gmra.mrb[10].mxu0 %vm177_vm3, %v699_v47 }
 0x9b6   :  { %2230 = vmatpush1.bf16.msra.mxu0 %v2825_v4  ;;  %978 = vmatprep.mubr.f32.mxu0 %v2742_v1 }
 0x9b7   :  { %2232 = vmatprep.subr.bf16.mxu0 %v2830_v6 }
 0x9ba   :  { %2234 = vmatpush1.bf16.msra.mxu0 %v2843_v8 }
 0x9bb   :  { %2236 = vmatprep.subr.bf16.mxu0 %v2849_v9 }
 0x9be   :  { %2238 = vmatpush1.bf16.msra.mxu0 %v2861_v11 }
 0x9bf   :  { %2240 = vmatprep.subr.bf16.mxu0 %v2868_v12 }
 0x9c2   :  { %2242 = vmatpush1.bf16.msra.mxu0 %v2877_v13 }
 0xa88   :  { %v774_v49 = vpop.f32.mrb[10].mxu0 }
 0xa89   :  { %v775_v51 = vadd.f32 %v774_v49, %v702_v48  ;;  %v776_v52 = vpop.f32.mrb[11].mxu0 }
 0xa8a   :  { %v777_v53 = vadd.f32 %v776_v52, %v703_v50 }
 0xa8b   :  { %v1875_v54 = vmul.f32 -1.442695, %v775_v51 }
 0xa8c   :  { %v1876_v55 = vmul.f32 -1.442695, %v777_v53 }
 0xa8d   :  { %2702 = vpow2.f32 %v1875_v54 }
 0xa8e   :  { %2704 = vpow2.f32 %v1876_v55 }
 0xa97   :  { %v2703_v56 = vpop.eup %2702 }
 0xa98   :  { %v2705_v57 = vpop.eup %2704  ;;  %v785_v59 = vadd.f32 1.0, %v2703_v56 }
 0xa99   :  { %v786_v58 = vadd.f32 1.0, %v2705_v57 }
 0xa9b   :  { %2706 = vrcp.f32 %v786_v58 }
 0xa9c   :  { %2708 = vrcp.f32 %v785_v59 }
 0xaa5   :  { %v2707_v60 = vpop.eup %2706 }
 0xaa6   :  { %v791_v61 = vmul.f32 2.0, %v2707_v60  ;;  %v2709_v63 = vpop.eup %2708 }
 0xaa7   :  { %v793_v2 = vmul.f32 %v2709_v63, %v694_v44 }
 0xaa8   :  { %v1877_v62 = vadd.f32 -1.0, %v791_v61 }
 0xaaa   :  { %v794_v0 = vmul.f32 %v2709_v63, %v1877_v62 }
 0xaac   :  { %796 = vrot.lane.b32.xlu0 %v794_v0, %s2743_s3 }
 0xb1e   :  { %v797_v5 = vpop.permute.xlu0 %796 }
 0xb1f   :  { %v799_v7 = vadd.f32 %v797_v5, %v793_v2 }
 0xb21   :  { %2710 = vtanh.f32 %v799_v7 }
 0xb2b   :  { %v2711_v25 = vpop.eup %2710 }
 0xb2c   :  { %v801_v10 = vmul.f32 %v2711_v25, %v2707_v60 }
 0xb2e   :  { %803 = vrot.lane.b32.xlu1 %v801_v10, %s2743_s3 }
 0xba0   :  { %v804_v26 = vpop.permute.xlu1 %803 }
 0xba1   :  { %1878 = vmatmul.mubr.msk.f32.vlgmr.msra.gmra.mrb[4].mxu1 %vm177_vm3, %v804_v26 }
 0xba2   :  { %2246 = vmatpush1.bf16.msra.mxu1 %v2825_v4  ;;  %1077 = vmatprep.mubr.f32.mxu1 %v2742_v1 }
 0xba3   :  { %2248 = vmatprep.subr.bf16.mxu1 %v2830_v6 }
 0xba6   :  { %2250 = vmatpush1.bf16.msra.mxu1 %v2843_v8 }
 0xba7   :  { %2252 = vmatprep.subr.bf16.mxu1 %v2849_v9 }
 0xbaa   :  { %2254 = vmatpush1.bf16.msra.mxu1 %v2861_v11 }
 0xbab   :  { %2256 = vmatprep.subr.bf16.mxu1 %v2868_v12 }
 0xbae   :  { %2258 = vmatpush1.bf16.msra.mxu1 %v2877_v13 }
 0xc74   :  { %v877_v15 = vpop.f32.mrb[4].mxu1 }
 0xc75   :  { %v878_v4 = vadd.f32 %v877_v15, %v805_v14  ;;  %v879_v21 = vpop.f32.mrb[5].mxu1 }
 0xc76   :  { %v880_v27 = vadd.f32 %v879_v21, %v806_v16  ;;  %v2577_v21 = vld [vmem:[%s3301_s4 + $0x18] ss:$12 sps:$4 sm:$0xff]  }
 0xc77   :  { %v1879_v30 = vmul.f32 -1.442695, %v878_v4  ;;  %v2575_v4 = vld [vmem:[%s3301_s4 + $0x1c] ss:$12 sps:$4 sm:$0xff]  }
 0xc78   :  { %v1880_v6 = vmul.f32 -1.442695, %v880_v27  ;;  %v2744_v27 = vmov 0.0|0.0  }
 0xc79   :  { %2712 = vpow2.f32 %v1879_v30 }
 0xc7a   :  { %2714 = vpow2.f32 %v1880_v6 }
 0xc83   :  { %v2713_v8 = vpop.eup %2712 }
 0xc84   :  { %v2715_v9 = vpop.eup %2714  ;;  %v888_v11 = vadd.f32 1.0, %v2713_v8 }
 0xc85   :  { %v889_v31 = vadd.f32 1.0, %v2715_v9  ;;  %v2580_v9 = vld [vmem:[%s3302_s6 + $0x4] ss:$8 sps:$4 sm:$0xff]  }
 0xc86   :  { %2274 = vmatprep.subr.bf16.mxu1 %v2580_v9  ;;  %v2630_v9 = vld [vmem:[%s3302_s6 + $0x100] ss:$8 sps:$4 sm:$0xff]  }
 0xc87   :  { %2716 = vrcp.f32 %v889_v31 }
 0xc88   :  { %2718 = vrcp.f32 %v888_v11  ;;  %v2582_v11 = vld [vmem:[%s3302_s6] ss:$8 sps:$4 sm:$0xff]  }
 0xc91   :  { %v2717_v12 = vpop.eup %2716 }
 0xc92   :  { %v894_v13 = vmul.f32 2.0, %v2717_v12  ;;  %v2719_v33 = vpop.eup %2718 }
 0xc93   :  { %v896_v35 = vmul.f32 %v2719_v33, %v799_v7 }
 0xc94   :  { %v1881_v32 = vadd.f32 -1.0, %v894_v13  ;;  %v2583_v13 = vld [vmem:[%s3302_s6 + $0x14] ss:$8 sps:$4 sm:$0xff]  }
 0xc96   :  { %v897_v34 = vmul.f32 %v2719_v33, %v1881_v32  ;;  %v2585_v32 = vld [vmem:[%s3302_s6 + $0x10] ss:$8 sps:$4 sm:$0xff]   ;;  %v2586_v33 = vld [vmem:[%s3302_s6 + $0x24] ss:$8 sps:$4 sm:$0xff]  }
 0xc98   :  { %899 = vrot.lane.b32.xlu0 %v897_v34, %s2743_s3  ;;  %v2588_v34 = vld [vmem:[%s3302_s6 + $0x20] ss:$8 sps:$4 sm:$0xff]  }
 0xd0a   :  { %v900_v36 = vpop.permute.xlu0 %899 }
 0xd0b   :  { %v902_v3 = vadd.f32 %v900_v36, %v896_v35  ;;  %v2589_v35 = vld [vmem:[%s3302_s6 + $0x34] ss:$8 sps:$4 sm:$0xff]   ;;  %v2591_v36 = vld [vmem:[%s3302_s6 + $0x30] ss:$8 sps:$4 sm:$0xff]  }
 0xd0d   :  { %2720 = vtanh.f32 %v902_v3 }
 0xd17   :  { %v2721_v37 = vpop.eup %2720 }
 0xd18   :  { %v904_v38 = vmul.f32 %v2721_v37, %v2717_v12  ;;  %v2594_v37 = vld [vmem:[%s3302_s6 + $0x40] ss:$8 sps:$4 sm:$0xff]  }
 0xd1a   :  { %906 = vrot.lane.b32.xlu1 %v904_v38, %s2743_s3  ;;  %v2595_v38 = vld [vmem:[%s3302_s6 + $0x54] ss:$8 sps:$4 sm:$0xff]  }
 0xd8c   :  { %v907_v18 = vpop.permute.xlu1 %906 }
 0xd8d   :  { %1882 = vmatmul.mubr.msk.f32.vlgmr.msra.gmra.mrb[12].mxu0 %vm177_vm3, %v907_v18  ;;  %v2597_v18 = vld [vmem:[%s3302_s6 + $0x50] ss:$8 sps:$4 sm:$0xff]  }
 0xd8e   :  { %1214 = vmatprep.mubr.f32.mxu0 %v2742_v1 }
 0xe60   :  { %v980_v19 = vpop.f32.mrb[12].mxu0 }
 0xe61   :  { %v981_v41 = vadd.f32 %v980_v19, %v908_v39  ;;  %v982_v42 = vpop.f32.mrb[13].mxu0  ;;  %v2598_v39 = vld [vmem:[%s3302_s6 + $0x64] ss:$8 sps:$4 sm:$0xff]   ;;  %v2600_v19 = vld [vmem:[%s3302_s6 + $0x60] ss:$8 sps:$4 sm:$0xff]  }
 0xe62   :  { %v983_v43 = vadd.f32 %v982_v42, %v909_v40  ;;  %v2601_v40 = vld [vmem:[%s3302_s6 + $0x74] ss:$8 sps:$4 sm:$0xff]   ;;  %v2604_v42 = vld [vmem:[%s3302_s6 + $0x84] ss:$8 sps:$4 sm:$0xff]  }
 0xe63   :  { %v1883_v44 = vmul.f32 -1.442695, %v981_v41  ;;  %v2603_v41 = vld [vmem:[%s3302_s6 + $0x70] ss:$8 sps:$4 sm:$0xff]  }
 0xe64   :  { %v1884_v45 = vmul.f32 -1.442695, %v983_v43  ;;  %v2606_v43 = vld [vmem:[%s3302_s6 + $0x80] ss:$8 sps:$4 sm:$0xff]  }
 0xe65   :  { %2722 = vpow2.f32 %v1883_v44  ;;  %v2607_v44 = vld [vmem:[%s3302_s6 + $0x94] ss:$8 sps:$4 sm:$0xff]  }
 0xe66   :  { %2724 = vpow2.f32 %v1884_v45  ;;  %v2609_v45 = vld [vmem:[%s3302_s6 + $0x90] ss:$8 sps:$4 sm:$0xff]  }
 0xe6f   :  { %v2723_v46 = vpop.eup %2722 }
 0xe70   :  { %v2725_v47 = vpop.eup %2724  ;;  %v991_v49 = vadd.f32 1.0, %v2723_v46  ;;  %v2610_v46 = vld [vmem:[%s3302_s6 + $0xa4] ss:$8 sps:$4 sm:$0xff]  }
 0xe71   :  { %v992_v48 = vadd.f32 1.0, %v2725_v47  ;;  %v2612_v47 = vld [vmem:[%s3302_s6 + $0xa0] ss:$8 sps:$4 sm:$0xff]  }
 0xe73   :  { %2726 = vrcp.f32 %v992_v48  ;;  %v2613_v48 = vld [vmem:[%s3302_s6 + $0xb4] ss:$8 sps:$4 sm:$0xff]  }
 0xe74   :  { %2728 = vrcp.f32 %v991_v49  ;;  %v2615_v49 = vld [vmem:[%s3302_s6 + $0xb0] ss:$8 sps:$4 sm:$0xff]  }
 0xe7d   :  { %v2727_v50 = vpop.eup %2726 }
 0xe7e   :  { %v997_v51 = vmul.f32 2.0, %v2727_v50  ;;  %v2729_v28 = vpop.eup %2728 }
 0xe7f   :  { %v999_v29 = vmul.f32 %v2729_v28, %v902_v3  ;;  %v2592_v3 = vld [vmem:[%s3302_s6 + $0x44] ss:$8 sps:$4 sm:$0xff]  }
 0xe80   :  { %v1885_v52 = vadd.f32 -1.0, %v997_v51  ;;  %v2618_v51 = vld [vmem:[%s3302_s6 + $0xc0] ss:$8 sps:$4 sm:$0xff]  }
 0xe82   :  { %v1000_v53 = vmul.f32 %v2729_v28, %v1885_v52  ;;  %v2619_v52 = vld [vmem:[%s3302_s6 + $0xd4] ss:$8 sps:$4 sm:$0xff]   ;;  %v2621_v28 = vld [vmem:[%s3302_s6 + $0xd0] ss:$8 sps:$4 sm:$0xff]  }
 0xe84   :  { %1002 = vrot.lane.b32.xlu0 %v1000_v53, %s2743_s3  ;;  %v2622_v53 = vld [vmem:[%s3302_s6 + $0xe4] ss:$8 sps:$4 sm:$0xff]  }
 0xef6   :  { %v1003_v54 = vpop.permute.xlu0 %1002 }
 0xef7   :  { %v1005_v55 = vadd.f32 %v1003_v54, %v999_v29  ;;  %v2624_v29 = vld [vmem:[%s3302_s6 + $0xe0] ss:$8 sps:$4 sm:$0xff]  }
 0xef8   :  { %v2578_v54 = vld [vmem:[%s3301_s4 + $0x8] ss:$12 sps:$4 sm:$0xff]  }
 0xef9   :  { %2730 = vtanh.f32 %v1005_v55 }
 0xf03   :  { %v2731_v56 = vpop.eup %2730 }
 0xf04   :  { %v1007_v57 = vmul.f32 %v2731_v56, %v2727_v50  ;;  %v2616_v50 = vld [vmem:[%s3302_s6 + $0xc4] ss:$8 sps:$4 sm:$0xff]  }
 0xf05   :  { %v2579_v56 = vld [vmem:[%s3301_s4 + $0x20] ss:$12 sps:$4 sm:$0xff]  }
 0xf06   :  { %1009 = vrot.lane.b32.xlu1 %v1007_v57, %s2743_s3  ;;  %v2625_v57 = vld [vmem:[%s3302_s6 + $0xf4] ss:$8 sps:$4 sm:$0xff]  }
 0xf78   :  { %v1010_v58 = vpop.permute.xlu1 %1009 }
 0xf79   :  { %1886 = vmatmul.mubr.msk.f32.vlgmr.msra.gmra.mrb[6].mxu1 %vm177_vm3, %v1010_v58  ;;  %v2627_v58 = vld [vmem:[%s3302_s6 + $0xf0] ss:$8 sps:$4 sm:$0xff]  }
 0xf7a   :  { %2276 = vmatpush1.bf16.msra.mxu1 %v2582_v11  ;;  %v2631_v11 = vld [vmem:[%s3302_s6 + $0x114] ss:$8 sps:$4 sm:$0xff]  }
 0xf7b   :  { %2278 = vmatprep.subr.bf16.mxu1 %v2583_v13  ;;  %v2633_v13 = vld [vmem:[%s3302_s6 + $0x110] ss:$8 sps:$4 sm:$0xff]  }
 0xf7e   :  { %2280 = vmatpush1.bf16.msra.mxu1 %v2585_v32 }
 0xf7f   :  { %2282 = vmatprep.subr.bf16.mxu1 %v2586_v33  ;;  %v2634_v33 = vld [vmem:[%s3302_s6 + $0x124] ss:$8 sps:$4 sm:$0xff]  }
 0xf82   :  { %2284 = vmatpush1.bf16.msra.mxu1 %v2588_v34  ;;  %v2636_v34 = vld [vmem:[%s3302_s6 + $0x120] ss:$8 sps:$4 sm:$0xff]  }
 0xf83   :  { %2286 = vmatprep.subr.bf16.mxu1 %v2589_v35  ;;  %v2637_v35 = vld [vmem:[%s3302_s6 + $0x134] ss:$8 sps:$4 sm:$0xff]  }
 0xf86   :  { %2288 = vmatpush1.bf16.msra.mxu1 %v2591_v36  ;;  %v2639_v36 = vld [vmem:[%s3302_s6 + $0x130] ss:$8 sps:$4 sm:$0xff]  }
 0xf87   :  { %2290 = vmatprep.subr.bf16.mxu1 %v2592_v3  ;;  %v2640_v3 = vld [vmem:[%s3302_s6 + $0x144] ss:$8 sps:$4 sm:$0xff]  }
 0xf8a   :  { %2292 = vmatpush1.bf16.msra.mxu1 %v2594_v37  ;;  %v2642_v37 = vld [vmem:[%s3302_s6 + $0x140] ss:$8 sps:$4 sm:$0xff]  }
 0xf8b   :  { %2294 = vmatprep.subr.bf16.mxu1 %v2595_v38  ;;  %v2643_v38 = vld [vmem:[%s3302_s6 + $0x154] ss:$8 sps:$4 sm:$0xff]  }
 0xf8e   :  { %2296 = vmatpush1.bf16.msra.mxu1 %v2597_v18  ;;  %v2645_v18 = vld [vmem:[%s3302_s6 + $0x150] ss:$8 sps:$4 sm:$0xff]  }
 0xf8f   :  { %2298 = vmatprep.subr.bf16.mxu1 %v2598_v39  ;;  %v1139_v39 = vsub.s32 2, %v2895_v17  ;;  %v2651_v17 = vld [vmem:[%s3302_s6 + $0x170] ss:$8 sps:$4 sm:$0xff]  }
 0xf92   :  { %2300 = vmatpush1.bf16.msra.mxu1 %v2600_v19  ;;  %v2646_v19 = vld [vmem:[%s3302_s6 + $0x164] ss:$8 sps:$4 sm:$0xff]  }
 0xf93   :  { %2302 = vmatprep.subr.bf16.mxu1 %v2601_v40  ;;  %v2648_v40 = vld [vmem:[%s3302_s6 + $0x160] ss:$8 sps:$4 sm:$0xff]  }
 0xf96   :  { %2304 = vmatpush1.bf16.msra.mxu1 %v2603_v41 }
 0xf97   :  { %2306 = vmatprep.subr.bf16.mxu1 %v2604_v42  ;;  %v2649_v42 = vld [vmem:[%s3302_s6 + $0x174] ss:$8 sps:$4 sm:$0xff]  }
 0xf9a   :  { %2308 = vmatpush1.bf16.msra.mxu1 %v2606_v43 }
 0xf9b   :  { %2310 = vmatprep.subr.bf16.mxu1 %v2607_v44 }
 0xf9e   :  { %2312 = vmatpush1.bf16.msra.mxu1 %v2609_v45  ;;  %v1995_v45 = vld [vmem:[%s3303_s8 + $0x30] sm:$0xff]  }
 0xf9f   :  { %2314 = vmatprep.subr.bf16.mxu1 %v2610_v46  ;;  %v2004_v46 = vld [vmem:[%s3303_s8 + $0x78] sm:$0xff]  }
 0xfa2   :  { %2316 = vmatpush1.bf16.msra.mxu1 %v2612_v47  ;;  %v1996_v47 = vld [vmem:[%s3303_s8 + $0x38] sm:$0xff]  }
 0xfa3   :  { %2318 = vmatprep.subr.bf16.mxu1 %v2613_v48  ;;  %v1438_v48 = vld [vmem:[%s3305_s7] sm:$0x3] }
 0xfa6   :  { %2320 = vmatpush1.bf16.msra.mxu1 %v2615_v49  ;;  %v1443_v49 = vrot.slane %v1438_v48, %v2902_v20 }
 0xfa7   :  { %2322 = vmatprep.subr.bf16.mxu1 %v2616_v50  ;;  %v1447_v50 = vrot.slane %v1438_v48, %v2908_v22 }
 0xfaa   :  { %2324 = vmatpush1.bf16.msra.mxu1 %v2618_v51 }
 0xfab   :  { %2326 = vmatprep.subr.bf16.mxu1 %v2619_v52 }
 0xfae   :  { %2328 = vmatpush1.bf16.msra.mxu1 %v2621_v28 }
 0xfaf   :  { %2330 = vmatprep.subr.bf16.mxu1 %v2622_v53 }
 0xfb2   :  { %2332 = vmatpush1.bf16.msra.mxu1 %v2624_v29 }
 0xfb3   :  { %2334 = vmatprep.subr.bf16.mxu1 %v2625_v57  ;;  %v2009_v57 = vld [vmem:[%s3306_s10 + $0x28] sm:$0xff]  }
 0xfb6   :  { %2336 = vmatpush1.bf16.msra.mxu1 %v2627_v58  ;;  %v2010_v58 = vld [vmem:[%s3306_s10 + $0x30] sm:$0xff]  }
0x104c   :  { %v1079_v59 = vpop.f32.mrb[6].mxu1 }
0x104d   :  { %v1080_v60 = vadd.f32 %v1079_v59, %v2911_v23  ;;  %v1081_v61 = vpop.f32.mrb[7].mxu1  ;;  %v2572_v23 = vld [vmem:[%s3301_s4 + $0x4] ss:$12 sps:$4 sm:$0xff]  }
0x104e   :  { %v1082_v62 = vadd.f32 %v1081_v61, %v2914_v24  ;;  %v2574_v24 = vld [vmem:[%s3301_s4] ss:$12 sps:$4 sm:$0xff]   ;;  %2260 = vmatprep.subr.bf16.mxu0 %v2572_v23 }
0x104f   :  { %v1887_v63 = vmul.f32 -1.442695, %v1080_v60  ;;  %2262 = vmatpush1.bf16.msra.mxu0 %v2574_v24  ;;  %v2628_v59 = vld [vmem:[%s3302_s6 + $0x104] ss:$8 sps:$4 sm:$0xff]  }
0x1050   :  { %v1888_v0 = vmul.f32 -1.442695, %v1082_v62  ;;  %2264 = vmatprep.subr.bf16.mxu0 %v2575_v4  ;;  %2338 = vmatprep.subr.bf16.mxu1 %v2628_v59  ;;  %v1997_v60 = vld [vmem:[%s3303_s8 + $0x40] sm:$0xff]   ;;  %v1998_v62 = vld [vmem:[%s3303_s8 + $0x48] sm:$0xff]   ;;  %v2011_v59 = vld [vmem:[%s3306_s10 + $0x38] sm:$0xff]  }
0x1051   :  { %2732 = vpow2.f32 %v1887_v63  ;;  %v1895_v61 = vld [vmem:[%s3303_s8] sm:$0xff]   ;;  %v1990_v63 = vld [vmem:[%s3303_s8 + $0x8] sm:$0xff]  }
0x1052   :  { %2734 = vpow2.f32 %v1888_v0  ;;  %v1999_v0 = vld [vmem:[%s3303_s8 + $0x50] sm:$0xff]  }
0x1053   :  { %2266 = vmatpush1.bf16.msra.mxu0 %v2577_v21 }
0x1054   :  { %2267 = vmatprep.subr.bf16.mxu0 %v2744_v27 }
0x105b   :  { %v2733_v2 = vpop.eup %2732 }
0x105c   :  { %v2735_v5 = vpop.eup %2734  ;;  %v1090_v25 = vadd.f32 1.0, %v2733_v2  ;;  %v1991_v2 = vld [vmem:[%s3303_s8 + $0x10] sm:$0xff]  }
0x105d   :  { %v1091_v7 = vadd.f32 1.0, %v2735_v5  ;;  %v2000_v5 = vld [vmem:[%s3303_s8 + $0x58] sm:$0xff]  }
0x105f   :  { %2736 = vrcp.f32 %v1091_v7  ;;  %v1992_v7 = vld [vmem:[%s3303_s8 + $0x18] sm:$0xff]  }
0x1060   :  { %2738 = vrcp.f32 %v1090_v25  ;;  %v2001_v25 = vld [vmem:[%s3303_s8 + $0x60] sm:$0xff]  }
0x1069   :  { %v2737_v10 = vpop.eup %2736 }
0x106a   :  { %v1096_v26 = vmul.f32 2.0, %v2737_v10  ;;  %v2739_v15 = vpop.eup %2738 }
0x106b   :  { %v1098_v30 = vmul.f32 %v2739_v15, %v1005_v55 }
0x106c   :  { %v1889_v14 = vadd.f32 -1.0, %v1096_v26  ;;  %v2002_v26 = vld [vmem:[%s3303_s8 + $0x68] sm:$0xff]  }
0x106e   :  { %v1099_v16 = vmul.f32 %v2739_v15, %v1889_v14  ;;  %v1994_v14 = vld [vmem:[%s3303_s8 + $0x28] sm:$0xff]   ;;  %v2003_v15 = vld [vmem:[%s3303_s8 + $0x70] sm:$0xff]  }
0x1070   :  { %1101 = vrot.lane.b32.xlu0 %v1099_v16, %s2743_s3  ;;  %v1127_v16 = vld [vmem:[%s3304_s5] sm:$0x7] }
0x1071   :  { %v1132_v23 = vrot.slane %v1127_v16, %v2902_v20  ;;  %v1136_v24 = vrot.slane %v1127_v16, %v2908_v22  ;;  %v1140_v41 = vrot.slane %v1127_v16, %v1139_v39  ;;  %v2005_v20 = vld [vmem:[%s3306_s10 + $0x8] sm:$0xff]   ;;  %v2006_v22 = vld [vmem:[%s3306_s10 + $0x10] sm:$0xff]  }
0x10e2   :  { %v1102_v6 = vpop.permute.xlu0 %1101 }
0x10e3   :  { %v1104_v8 = vadd.f32 %v1102_v6, %v1098_v30 }
0x10e5   :  { %2740 = vtanh.f32 %v1104_v8 }
0x10ef   :  { %v2741_v31 = vpop.eup %2740 }
0x10f0   :  { %v1106_v12 = vmul.f32 %v2741_v31, %v2737_v10  ;;  %v1993_v10 = vld [vmem:[%s3303_s8 + $0x20] sm:$0xff]  }
0x10f2   :  { %1145 = vrot.lane.b32.xlu1 %v1106_v12, %s2745_s21 }
0x1164   :  { %v1146_v55 = vpop.permute.xlu1 %1145 }
0x1165   :  { %1890 = vmatmul.mubr.msk.f32.vlgmr.msra.gmra.mrb[14].mxu0 %vm1147_vm4, %v1146_v55 }
0x1166   :  { %2269 = vmatpush3.bf16.msra.mxu0 %v2578_v54  ;;  %2077 = vmatprep.mubr.msk.f32.mxu0 %vm2746_vm5, %v2742_v1 }
0x1167   :  { %2270 = vmatprep.subr.bf16.mxu0 %v2744_v27 }
0x116a   :  { %2272 = vmatpush3.bf16.msra.mxu0 %v2579_v56  ;;  %v2008_v56 = vld [vmem:[%s3306_s10 + $0x20] sm:$0xff]  }
0x116b   :  { %2370 = vmatprep.subr.bf16.mxu0 %v1997_v60  ;;  %v17_v60 = vstv %s3307_s11 }
0x116c   :  { %18 = vst [vmem:[#allocation2] sm:$0x1] %v17_v60 }
0x116d   :  { %2078 = vmatmul.mubr.msk.f32.vlgmr.msra.gmra.mrb[16].mxu0 %vm1147_vm4, %v1146_v55  ;;  %v1959_v55 = vld [vmem:[%s3306_s10] sm:$0xff]  }
0x116e   :  { %2372 = vmatpush3.bf16.msra.mxu0 %v1895_v61 }
0x116f   :  { %2374 = vmatprep.subr.bf16.mxu0 %v1998_v62  ;;  %v1892_v62 = vld [vmem:[%s3308_s9] ss:$0 sm:$0xff] }
0x1172   :  { %2376 = vmatpush3.bf16.msra.mxu0 %v1990_v63 }
0x1173   :  { %2378 = vmatprep.subr.bf16.mxu0 %v1999_v0 }
0x1176   :  { %2380 = vmatpush3.bf16.msra.mxu0 %v1991_v2 }
0x1177   :  { %2382 = vmatprep.subr.bf16.mxu0 %v2000_v5 }
0x117a   :  { %2384 = vmatpush3.bf16.msra.mxu0 %v1992_v7 }
0x117b   :  { %2386 = vmatprep.subr.bf16.mxu0 %v2001_v25 }
0x117e   :  { %2388 = vmatpush3.bf16.msra.mxu0 %v1993_v10 }
0x117f   :  { %2390 = vmatprep.subr.bf16.mxu0 %v2002_v26 }
0x1182   :  { %2392 = vmatpush3.bf16.msra.mxu0 %v1994_v14 }
0x1183   :  { %2394 = vmatprep.subr.bf16.mxu0 %v2003_v15 }
0x1186   :  { %2396 = vmatpush3.bf16.msra.mxu0 %v1995_v45 }
0x1187   :  { %2398 = vmatprep.subr.bf16.mxu0 %v2004_v46 }
0x118a   :  { %2400 = vmatpush3.bf16.msra.mxu0 %v1996_v47 }
0x118b   :  { %2401 = vmatprep.subr.bf16.mxu0 %v2744_v27 }
0x1238   :  { %v1216_v4 = vpop.f32.mrb[14].mxu0 }
0x1239   :  { %v1217_v21 = vadd.f32 %v1216_v4, %v1132_v23  ;;  %v1218_v30 = vpop.f32.mrb[15].mxu0 }
0x123a   :  { %v1219_v6 = vadd.f32 %v1218_v30, %v1136_v24 }
0x123b   :  { %v1291_v31 = vmax.f32 %v1217_v21, 0.0 }
0x123c   :  { %v1292_v8 = vmax.f32 %v1219_v6, 0.0 }
0x123e   :  { %1514 = vmatprep.mubr.f32.mxu1 %v1292_v8 }
0x123f   :  { %1515 = vmatmul.mubr.f32.vlgmr.msra.gmra.mrb[8].mxu1 %v1291_v31 }
0x1240   :  { %v1287_v12 = vpop.f32.mrb[16].mxu0  ;;  %2340 = vmatpush1.bf16.msra.mxu1 %v2630_v9  ;;  %1585 = vmatprep.mubr.f32.mxu1 %v2742_v1 }
0x1241   :  { %v2079_v32 = vpop.f32.mrb[17].mxu0  ;;  %2342 = vmatprep.subr.bf16.mxu1 %v2631_v11  ;;  %v1288_v43 = vadd.f32 %v1287_v12, %v1140_v41 }
0x1243   :  { %v1293_v44 = vmax.f32 %v1288_v43, 0.0 }
0x1244   :  { %2344 = vmatpush1.bf16.msra.mxu1 %v2633_v13 }
0x1245   :  { %2346 = vmatprep.subr.bf16.mxu1 %v2634_v33 }
0x1248   :  { %2348 = vmatpush1.bf16.msra.mxu1 %v2636_v34 }
0x1249   :  { %2350 = vmatprep.subr.bf16.mxu1 %v2637_v35 }
0x124c   :  { %2352 = vmatpush1.bf16.msra.mxu1 %v2639_v36 }
0x124d   :  { %2354 = vmatprep.subr.bf16.mxu1 %v2640_v3 }
0x1250   :  { %2356 = vmatpush1.bf16.msra.mxu1 %v2642_v37 }
0x1251   :  { %2358 = vmatprep.subr.bf16.mxu1 %v2643_v38 }
0x1254   :  { %2360 = vmatpush1.bf16.msra.mxu1 %v2645_v18 }
0x1255   :  { %2362 = vmatprep.subr.bf16.mxu1 %v2646_v19 }
0x1258   :  { %2364 = vmatpush1.bf16.msra.mxu1 %v2648_v40 }
0x1259   :  { %2366 = vmatprep.subr.bf16.mxu1 %v2649_v42 }
0x125c   :  { %2368 = vmatpush1.bf16.msra.mxu1 %v2651_v17 }
0x125f   :  { %1586 = vmatmul.mubr.f32.vlgmr.msra.gmra.mrb[8].mxu1 %v1293_v44 }
0x1332   :  { %v1587_v51 = vpop.f32.mrb[8].mxu1 }
0x1333   :  { %v2425_v52 = vadd.f32 %v1587_v51, %v1443_v49  ;;  %v1589_v28 = vpop.f32.mrb[9].mxu1 }
0x1334   :  { %v2426_v53 = vadd.f32 %v1589_v28, %v1447_v50 }
0x1335   :  { %v1592_v54 = vmax.f32 %v2425_v52, 0.0 }
0x1336   :  { %v1593_v29 = vmax.f32 %v2426_v53, 0.0 }
0x1338   :  { %1729 = vmatprep.mubr.f32.mxu0 %v1593_v29 }
0x1339   :  { %1730 = vmatmul.mubr.f32.vlgmr.msra.gmra.mrb[18].mxu0 %v1592_v54 }
0x133a   :  { %2403 = vmatpush3.bf16.msra.mxu0 %v1959_v55  ;;  %2112 = vmatprep.mubr.msk.f32.mxu0 %vm2746_vm5, %v2742_v1  ;;  %v2007_v1 = vld [vmem:[%s3306_s10 + $0x18] sm:$0xff]  }
0x133b   :  { %2404 = vmatprep.subr.bf16.mxu0 %v2744_v27 }
0x133e   :  { %2406 = vmatpush3.bf16.msra.mxu0 %v2005_v20 }
0x133f   :  { %2407 = vmatprep.subr.bf16.mxu0 %v2744_v27 }
0x1342   :  { %2409 = vmatpush3.bf16.msra.mxu0 %v2006_v22 }
0x1343   :  { %2410 = vmatprep.subr.bf16.mxu0 %v2744_v27 }
0x1346   :  { %2412 = vmatpush3.bf16.msra.mxu0 %v2007_v1 }
0x1347   :  { %2413 = vmatprep.subr.bf16.mxu0 %v2744_v27 }
0x134a   :  { %2415 = vmatpush3.bf16.msra.mxu0 %v2008_v56 }
0x134b   :  { %2416 = vmatprep.subr.bf16.mxu0 %v2744_v27 }
0x134e   :  { %2418 = vmatpush3.bf16.msra.mxu0 %v2009_v57 }
0x134f   :  { %2419 = vmatprep.subr.bf16.mxu0 %v2744_v27 }
0x1352   :  { %2421 = vmatpush3.bf16.msra.mxu0 %v2010_v58 }
0x1353   :  { %2422 = vmatprep.subr.bf16.mxu0 %v2744_v27  ;;  %v1893_v27 = vld [vmem:[#allocation2] ss:$0 sm:$0xff] }
0x1356   :  { %2424 = vmatpush3.bf16.msra.mxu0 %v2011_v59 }
0x140c   :  { %v2049_v61 = vpop.f32.mrb[18].mxu0 }
0x140d   :  { %v2050_v63 = vpop.f32.mrb[19].mxu0 }
0x140e   :  { %v2051_v0 = vadd.f32 %v2050_v63, %v2049_v61 }
0x1410   :  { %v1732_v2 = vadd.f32 %v2051_v0, %v1892_v62 }
0x1412   :  { %v1735_v5 = vmax.f32 %v1732_v2, 0.0 }
0x1414   :  { %2113 = vmatmul.mubr.f32.vlgmr.msra.gmra.mrb[20].mxu0 %v1735_v5 }
0x14e7   :  { %v1841_v7 = vpop.f32.mrb[20].mxu0 }
0x14e8   :  { %v1842_v25 = vadd.f32 %v1893_v27, %v1841_v7  ;;  %v2114_v10 = vpop.f32.mrb[21].mxu0 }
0x14ea   :  { %1846 = vst.msk [vmem:[%s3309_s12] sm:$0x3] %vm1845_vm6, %v1842_v25 }

</bundles_post_ra>
